<compile_context>
chip_gen: v5e
topology: v5e:2x2
jax: 0.10.0
libtpu: 0.0.40
codegen_flags: <defaults>
</compile_context>

<pallas_src>
import functools

import jax
import jax.numpy as jnp
import numpy as np
from jax import lax
from jax.experimental import pallas as pl
from jax.experimental.pallas import tpu as pltpu

EPS = 1e-5        # nn.LayerNorm default eps
NEG_BIG = -1e30   # additive key-padding mask value


# ---------------------------------------------------------------------------
# tiling helpers
# ---------------------------------------------------------------------------
def _round_up(n, m):
    return ((n + m - 1) // m) * m


def _row_tile(n, max_tile=256):
    """Row tile for (rows, D) kernels.

    Prefers a multiple-of-8 divisor of round_up(n, 8) (no padded rows) that
    leaves >=2 row blocks (keeps both v7x TensorCores busy); falls back to
    max_tile with < one tile of padded rows for awkward row counts.
    """
    n8 = _round_up(n, 8)
    best = 8
    t = 8
    limit = min(max_tile, n8)
    while t <= limit:
        if n8 % t == 0 and (n8 // t >= 2 or n8 <= 8):
            best = t
        t += 8
    if n8 > max_tile and best < max_tile // 4:
        best = max_tile
    return best, _round_up(n, best)


def _f_tile(f, max_tile=512):
    """FFN hidden-dim (reduction axis) tile; ragged F is zero-padded."""
    if f <= max_tile:
        return f, f
    return max_tile, _round_up(f, max_tile)


def _seq_tile(s, max_tile=256):
    """Flash-attention seq tile (256 fills the 256-wide v6e/v7x MXU); ragged
    S is padded and padded keys masked via the additive bias."""
    s8 = _round_up(s, 8)
    if s8 <= max_tile:
        return s8, s8
    return max_tile, _round_up(s8, max_tile)


def _batches_per_block(batch, heads, target=16):
    """Batches per flash bh-block: tbh = bpb*heads ~ target to amortize
    per-grid-step overhead when head_dim < 128, keeping >=2 bh blocks when
    possible so megacore still splits the parallel axis."""
    bpb = max(1, min(batch, target // max(heads, 1)))
    while batch % bpb:
        bpb -= 1
    while bpb > 1 and batch // bpb < 2:
        bpb -= 1
        while batch % bpb:
            bpb -= 1
    return max(bpb, 1)


def _pad_rows(x, n_pad):
    n = x.shape[0]
    return x if n_pad == n else jnp.pad(x, ((0, n_pad - n), (0, 0)))


# ---------------------------------------------------------------------------
# Kernel 1: residual FFN block + LayerNorm, hidden dim tiled as reduction axis
#   out = LN( x + fc2( relu( fc1(x) ) ) )
# The output block is VMEM-resident across the f axis and doubles as the f32
# accumulator (no extra scratch).
# ---------------------------------------------------------------------------
def _ffn_ln_kernel(x_ref, w1_ref, b1_ref, w2_ref, b2_ref, g_ref, be_ref, o_ref):
    f = pl.program_id(1)

    @pl.when(f == 0)
    def _():
        o_ref[...] = jnp.zeros_like(o_ref)

    x = x_ref[...]                                              # (tm, D) f32
    # bf16 MXU operands, f32 accumulation
    h = jnp.dot(x.astype(jnp.bfloat16), w1_ref[...],
                preferred_element_type=jnp.float32) + b1_ref[...]
    h = jnp.maximum(h, 0.0)                                     # ReLU in f32
    # TODO(synk): F.dropout(relu_dropout)/F.dropout(dropout) are identity at inference.
    o_ref[...] += jnp.dot(h.astype(jnp.bfloat16), w2_ref[...],
                          preferred_element_type=jnp.float32)

    @pl.when(f == pl.num_programs(1) - 1)
    def _():
        y = x + o_ref[...] + b2_ref[...]                        # residual, f32
        mu = jnp.mean(y, axis=-1, keepdims=True)
        var = jnp.mean((y - mu) ** 2, axis=-1, keepdims=True)
        o_ref[...] = (y - mu) * lax.rsqrt(var + EPS) * g_ref[...] + be_ref[...]


def ffn_ln_block(xp, w1, b1, w2, b2, gamma, beta, tm):
    """out = LN(x + fc2(relu(fc1(x)))) on a padded flat (n_pad, D) activation."""
    n_pad, D = xp.shape
    F = w1.shape[1]
    tf, Fp = _f_tile(F)
    if Fp != F:                                   # zero-pad ragged hidden dim
        w1 = jnp.pad(w1, ((0, 0), (0, Fp - F)))
        b1 = jnp.pad(b1, ((0, Fp - F),))
        w2 = jnp.pad(w2, ((0, Fp - F), (0, 0)))
    grid = (n_pad // tm, Fp // tf)
    return pl.pallas_call(
        _ffn_ln_kernel,
        out_shape=jax.ShapeDtypeStruct((n_pad, D), jnp.float32),
        grid=grid,
        in_specs=[
            pl.BlockSpec((tm, D), lambda i, f: (i, 0)),
            pl.BlockSpec((D, tf), lambda i, f: (0, f)),
            pl.BlockSpec((1, tf), lambda i, f: (0, f)),
            pl.BlockSpec((tf, D), lambda i, f: (f, 0)),
            pl.BlockSpec((1, D), lambda i, f: (0, 0)),
            pl.BlockSpec((1, D), lambda i, f: (0, 0)),
            pl.BlockSpec((1, D), lambda i, f: (0, 0)),
        ],
        out_specs=pl.BlockSpec((tm, D), lambda i, f: (i, 0)),
        compiler_params=pltpu.CompilerParams(
            dimension_semantics=("parallel", "arbitrary")),
    )(xp, w1.astype(jnp.bfloat16), b1.reshape(1, Fp),
      w2.astype(jnp.bfloat16), b2.reshape(1, D),
      gamma.reshape(1, D), beta.reshape(1, D))


# ---------------------------------------------------------------------------
# Kernel 2a: fused QKV projection; (D, 3D) weight column-tiled, bf16 output
# ---------------------------------------------------------------------------
def _qkv_kernel(x_ref, w_ref, b_ref, o_ref):
    y = jnp.dot(x_ref[...].astype(jnp.bfloat16), w_ref[...],
                preferred_element_type=jnp.float32) + b_ref[...]
    o_ref[...] = y.astype(o_ref.dtype)


def _qkv_proj(xp, wqkv, bqkv, tm):
    n_pad, D = xp.shape
    D3 = wqkv.shape[1]
    # column-tile the fused weight so it is never fully VMEM-resident
    tc = D if (D3 >= 768 and D % 128 == 0) else D3
    grid = (n_pad // tm, D3 // tc)
    return pl.pallas_call(
        _qkv_kernel,
        out_shape=jax.ShapeDtypeStruct((n_pad, D3), jnp.bfloat16),
        grid=grid,
        in_specs=[
            pl.BlockSpec((tm, D), lambda i, j: (i, 0)),
            pl.BlockSpec((D, tc), lambda i, j: (0, j)),
            pl.BlockSpec((1, tc), lambda i, j: (0, j)),
        ],
        out_specs=pl.BlockSpec((tm, tc), lambda i, j: (i, j)),
        compiler_params=pltpu.CompilerParams(
            dimension_semantics=("parallel", "parallel")),
    )(xp, wqkv, bqkv.reshape(1, D3))


# ---------------------------------------------------------------------------
# Kernel 2b: flash-attention core over (batch*heads, seq, head_dim)
#   grid = (bh-blocks, q-tiles, kv-tiles), online softmax, batched heads
# ---------------------------------------------------------------------------
def _flash_kernel(q_ref, k_ref, v_ref, bias_ref, o_ref, m_sc, l_sc, acc_sc, *,
                  heads):
    kv = pl.program_id(2)

    @pl.when(kv == 0)
    def _():
        m_sc[...] = jnp.full_like(m_sc, -jnp.inf)
        l_sc[...] = jnp.zeros_like(l_sc)
        acc_sc[...] = jnp.zeros_like(acc_sc)

    # bf16 q/k on the MXU, f32 scores
    s = jnp.einsum("bqd,bkd->bqk", q_ref[...], k_ref[...],
                   preferred_element_type=jnp.float32)
    bpb, _, tk = bias_ref.shape                    # (batches_per_block, 1, tk)
    bias = jnp.broadcast_to(bias_ref[...][:, None, :, :], (bpb, heads, 1, tk))
    s = s + bias.reshape(bpb * heads, 1, tk)       # additive key-padding mask

    m_new = jnp.maximum(m_sc[...], s.max(-1, keepdims=True))
    alpha = jnp.exp(m_sc[...] - m_new)
    p = jnp.exp(s - m_new)                         # f32 exp (v5e-safe)
    l_sc[...] = alpha * l_sc[...] + p.sum(-1, keepdims=True)
    acc_sc[...] = alpha * acc_sc[...] + jnp.einsum(
        "bqk,bkd->bqd", p.astype(jnp.bfloat16), v_ref[...],
        preferred_element_type=jnp.float32)
    m_sc[...] = m_new

    @pl.when(kv == pl.num_programs(2) - 1)
    def _():
        inv_l = pl.reciprocal(l_sc[...], approx=True)   # EUP slot, ~free
        o_ref[...] = (acc_sc[...] * inv_l).astype(o_ref.dtype)


def _flash_attention(qb, kb, vb, bias, heads, ts):
    BH, Sp, hd = qb.shape
    B = BH // heads
    bpb = _batches_per_block(B, heads)
    tbh = bpb * heads
    grid = (BH // tbh, Sp // ts, Sp // ts)
    return pl.pallas_call(
        functools.partial(_flash_kernel, heads=heads),
        out_shape=jax.ShapeDtypeStruct((BH, Sp, hd), jnp.bfloat16),
        grid=grid,
        in_specs=[
            pl.BlockSpec((tbh, ts, hd), lambda b, qi, ki: (b, qi, 0)),
            pl.BlockSpec((tbh, ts, hd), lambda b, qi, ki: (b, ki, 0)),
            pl.BlockSpec((tbh, ts, hd), lambda b, qi, ki: (b, ki, 0)),
            pl.BlockSpec((bpb, 1, ts), lambda b, qi, ki: (b, 0, ki)),
        ],
        out_specs=pl.BlockSpec((tbh, ts, hd), lambda b, qi, ki: (b, qi, 0)),
        scratch_shapes=[
            pltpu.VMEM((tbh, ts, 1), jnp.float32),   # running max
            pltpu.VMEM((tbh, ts, 1), jnp.float32),   # running denominator
            pltpu.VMEM((tbh, ts, hd), jnp.float32),  # f32 accumulator
        ],
        compiler_params=pltpu.CompilerParams(
            dimension_semantics=("parallel", "parallel", "arbitrary")),
    )(qb, kb, vb, bias)


# ---------------------------------------------------------------------------
# Kernel 2c: output projection + residual + LayerNorm (row-tiled)
# ---------------------------------------------------------------------------
def _outproj_ln_kernel(x_ref, a_ref, wo_ref, bo_ref, g_ref, be_ref, o_ref):
    y = x_ref[...] + jnp.dot(a_ref[...], wo_ref[...],
                             preferred_element_type=jnp.float32) + bo_ref[...]
    mu = jnp.mean(y, axis=-1, keepdims=True)
    var = jnp.mean((y - mu) ** 2, axis=-1, keepdims=True)
    o_ref[...] = (y - mu) * lax.rsqrt(var + EPS) * g_ref[...] + be_ref[...]


def _out_proj_ln(xp, attn_p, wo, bo, gamma, beta, tm):
    n_pad, D = xp.shape
    grid = (n_pad // tm,)
    row = pl.BlockSpec((tm, D), lambda i: (i, 0))
    vec = pl.BlockSpec((1, D), lambda i: (0, 0))
    return pl.pallas_call(
        _outproj_ln_kernel,
        out_shape=jax.ShapeDtypeStruct((n_pad, D), jnp.float32),
        grid=grid,
        in_specs=[row, row, pl.BlockSpec((D, D), lambda i: (0, 0)),
                  vec, vec, vec],
        out_specs=row,
        compiler_params=pltpu.CompilerParams(dimension_semantics=("parallel",)),
    )(xp, attn_p, wo.astype(jnp.bfloat16), bo.reshape(1, D),
      gamma.reshape(1, D), beta.reshape(1, D))


# ---------------------------------------------------------------------------
# Multi-head self-attention block + residual + LayerNorm
# ---------------------------------------------------------------------------
def mha_ln_block(xp, pad_mask, p, num_heads, S, B, N, tm):
    n_pad, D = xp.shape
    H = num_heads
    hd = D // H
    BH = B * H
    scale = 1.0 / float(np.sqrt(hd))

    # fused (D, 3D) QKV weight with 1/sqrt(hd) folded into the q slice, bf16 MXU
    wqkv = jnp.concatenate([p["wq"] * scale, p["wk"], p["wv"]],
                           axis=1).astype(jnp.bfloat16)
    bqkv = jnp.concatenate([p["bq"] * scale, p["bk"], p["bv"]])      # f32

    qkv = _qkv_proj(xp, wqkv, bqkv, tm)[:N]                          # (N,3D) bf16
    q, k, v = qkv[:, :D], qkv[:, D:2 * D], qkv[:, 2 * D:]

    # (S*B, D) -> (B*H, S, hd) head split; done by XLA in bf16 (half the HBM
    # bytes of the f32 version).
    # TODO(synk): emit q/k/v directly in (B*H, S, hd) from the projection
    # kernel to eliminate these layout passes entirely.
    def to_bh(t):
        return t.reshape(S, B, H, hd).transpose(1, 2, 0, 3).reshape(BH, S, hd)
    qb, kb, vb = map(to_bh, (q, k, v))

    ts, Sp = _seq_tile(S)
    if Sp != S:
        pad_s = ((0, 0), (0, Sp - S), (0, 0))
        qb, kb, vb = (jnp.pad(t, pad_s) for t in (qb, kb, vb))

    # additive key-padding bias, (B, 1, Sp); head broadcast happens in-kernel
    bias = jnp.where(pad_mask > 0.5, jnp.float32(NEG_BIG), jnp.float32(0.0))
    if Sp != S:
        bias = jnp.pad(bias, ((0, 0), (0, Sp - S)), constant_values=NEG_BIG)
    bias = bias.reshape(B, 1, Sp)

    attn = _flash_attention(qb, kb, vb, bias, H, ts)                 # bf16
    attn = attn[:, :S, :].reshape(B, H, S, hd).transpose(2, 0, 1, 3)
    attn_p = _pad_rows(attn.reshape(N, D), n_pad)

    return _out_proj_ln(xp, attn_p, p["wo"], p["bo"], p["ln_g"], p["ln_b"], tm)


# ---------------------------------------------------------------------------
# Full MANEncoderLayer forward (mix=False, no_man=False, normalize_before=False)
# The (n_pad, D) flat activation is threaded through all three blocks so the
# pad/slice round trips happen only once.
# ---------------------------------------------------------------------------
def man_encoder_layer(x, encoder_padding_mask, params, num_heads):
    S, B, D = x.shape
    N = S * B
    tm, n_pad = _row_tile(N)
    xp = _pad_rows(x.reshape(N, D), n_pad)

    # pre-MAN FFN block + LayerNorm[0]
    xp = ffn_ln_block(xp, params["pre_fc1_w"], params["pre_fc1_b"],
                      params["pre_fc2_w"], params["pre_fc2_b"],
                      params["ln0_g"], params["ln0_b"], tm)
    # self-attention block + LayerNorm[1]
    xp = mha_ln_block(xp, encoder_padding_mask, params["attn"],
                      num_heads, S, B, N, tm)
    # FFN block + LayerNorm[2]
    xp = ffn_ln_block(xp, params["fc1_w"], params["fc1_b"],
                      params["fc2_w"], params["fc2_b"],
                      params["ln2_g"], params["ln2_b"], tm)
    return xp[:N].reshape(S, B, D)


# ---------------------------------------------------------------------------
# Deterministic parameter init (xavier_uniform weights, zero bias, LN = 1/0)
# ---------------------------------------------------------------------------
def _xavier(key, fan_in, fan_out):
    limit = float(np.sqrt(6.0 / (fan_in + fan_out)))
    return jax.random.uniform(key, (fan_in, fan_out), jnp.float32, -limit, limit)


def init_params(key, embed_dim, ffn_dim):
    ks = jax.random.split(key, 10)
    D, F = embed_dim, ffn_dim
    z = lambda n: jnp.zeros((n,), jnp.float32)
    o = lambda n: jnp.ones((n,), jnp.float32)
    return {
        "pre_fc1_w": _xavier(ks[0], D, F), "pre_fc1_b": z(F),
        "pre_fc2_w": _xavier(ks[1], F, D), "pre_fc2_b": z(D),
        "ln0_g": o(D), "ln0_b": z(D),
        "attn": {
            "wq": _xavier(ks[2], D, D), "bq": z(D),
            "wk": _xavier(ks[3], D, D), "bk": z(D),
            "wv": _xavier(ks[4], D, D), "bv": z(D),
            "wo": _xavier(ks[5], D, D), "bo": z(D),
            "ln_g": o(D), "ln_b": z(D),
        },
        "fc1_w": _xavier(ks[6], D, F), "fc1_b": z(F),
        "fc2_w": _xavier(ks[7], F, D), "fc2_b": z(D),
        "ln2_g": o(D), "ln2_b": z(D),
    }


# ---------------------------------------------------------------------------
# Plain-JAX f32 reference (for correctness check)
# ---------------------------------------------------------------------------
def reference(x, pad_mask, p, num_heads):
    def ln(y, g, b):
        mu = y.mean(-1, keepdims=True)
        var = ((y - mu) ** 2).mean(-1, keepdims=True)
        return (y - mu) / jnp.sqrt(var + EPS) * g + b

    def ffn(y, w1, b1, w2, b2, g, be):
        h = jax.nn.relu(y @ w1 + b1)
        return ln(y + (h @ w2 + b2), g, be)

    x = ffn(x, p["pre_fc1_w"], p["pre_fc1_b"], p["pre_fc2_w"], p["pre_fc2_b"],
            p["ln0_g"], p["ln0_b"])

    a = p["attn"]
    S, B, D = x.shape
    H = num_heads
    hd = D // H
    q = ((x @ a["wq"] + a["bq"]) / jnp.sqrt(hd)).reshape(S, B, H, hd)
    k = (x @ a["wk"] + a["bk"]).reshape(S, B, H, hd)
    v = (x @ a["wv"] + a["bv"]).reshape(S, B, H, hd)
    scores = jnp.einsum("ibhd,jbhd->bhij", q, k)
    scores = jnp.where(pad_mask[:, None, None, :] > 0.5, NEG_BIG, scores)
    pr = jax.nn.softmax(scores, axis=-1)
    attn = jnp.einsum("bhij,jbhd->ibhd", pr, v).reshape(S, B, D)
    x = ln(x + (attn @ a["wo"] + a["bo"]), a["ln_g"], a["ln_b"])

    x = ffn(x, p["fc1_w"], p["fc1_b"], p["fc2_w"], p["fc2_b"],
            p["ln2_g"], p["ln2_b"])
    return x


if __name__ == "__main__":
    SEQ, BATCH, EMBED, HEADS, FFN = 8, 2, 32, 4, 64

    key = jax.random.PRNGKey(0)
    k_x, k_p = jax.random.split(key)
    x = jax.random.normal(k_x, (SEQ, BATCH, EMBED), jnp.float32)
    # padding mask (batch, src_len): 1 marks padding; batch 1 has 3 padded keys
    pad_mask = jnp.zeros((BATCH, SEQ), jnp.float32).at[1, SEQ - 3:].set(1.0)

    params = init_params(k_p, EMBED, FFN)

    fwd = jax.jit(functools.partial(man_encoder_layer, num_heads=HEADS))
    out = fwd(x, pad_mask, params)
    out = jax.block_until_ready(out)

    ref = reference(x, pad_mask, params, HEADS)
    # bf16 MXU operands (f32 accumulation) vs. the pure-f32 reference: a few
    # parts-per-thousand of error accumulates across the three residual blocks,
    # so the tolerance is relaxed accordingly.
    np.testing.assert_allclose(np.asarray(out), np.asarray(ref),
                               rtol=5e-2, atol=5e-2)
    assert out.shape == (SEQ, BATCH, EMBED)
    print("KERNEL_OK")
</pallas_src>

<mosaic_0001>
module attributes {stable_mosaic.version = 11 : i64} {
  func.func @_ffn_ln_kernel(%arg0: i32, %arg1: i32, %arg2: memref<8x32xf32, #tpu.memory_space<vmem>>, %arg3: memref<32x64xbf16, #tpu.memory_space<vmem>>, %arg4: memref<1x64xf32, #tpu.memory_space<vmem>>, %arg5: memref<64x32xbf16, #tpu.memory_space<vmem>>, %arg6: memref<1x32xf32, #tpu.memory_space<vmem>>, %arg7: memref<1x32xf32, #tpu.memory_space<vmem>>, %arg8: memref<1x32xf32, #tpu.memory_space<vmem>>, %arg9: memref<8x32xf32, #tpu.memory_space<vmem>>) attributes {dimension_semantics = [#tpu.dimension_semantics<parallel>, #tpu.dimension_semantics<arbitrary>], iteration_bounds = array<i64: 2, 1>, scalar_prefetch = 0 : i64, scratch_operands = 0 : i64, tpu.core_type = #tpu.core_type<tc>, window_params = [{transform_indices = @transform_0, window_bounds = array<i64: 8, 32>}, {transform_indices = @transform_1, window_bounds = array<i64: 32, 64>}, {transform_indices = @transform_2, window_bounds = array<i64: 1, 64>}, {transform_indices = @transform_3, window_bounds = array<i64: 64, 32>}, {pipeline_mode = #tpu.pipeline_mode<synchronous>, transform_indices = @transform_4, window_bounds = array<i64: 1, 32>}, {pipeline_mode = #tpu.pipeline_mode<synchronous>, transform_indices = @transform_5, window_bounds = array<i64: 1, 32>}, {pipeline_mode = #tpu.pipeline_mode<synchronous>, transform_indices = @transform_6, window_bounds = array<i64: 1, 32>}, {transform_indices = @transform_7, window_bounds = array<i64: 8, 32>}]} {
    %c0_i32 = arith.constant 0 : i32
    %0 = arith.cmpi eq, %arg1, %c0_i32 : i32
    %1 = arith.extui %0 : i1 to i32
    %c0_i32_0 = arith.constant 0 : i32
    %2 = arith.cmpi ne, %1, %c0_i32_0 : i32
    scf.if %2 {
      %cst_16 = arith.constant 0.000000e+00 : f32
      %21 = vector.broadcast %cst_16 : f32 to vector<8x32xf32>
      %c0_17 = arith.constant 0 : index
      %c0_18 = arith.constant 0 : index
      %22 = vector.load %arg9[%c0_17, %c0_18] : memref<8x32xf32, #tpu.memory_space<vmem>>, vector<8x32xf32>
      tpu.vector_store %arg9[%c0_17, %c0_18], %21 {strides = array<i32>} : memref<8x32xf32, #tpu.memory_space<vmem>>, vector<8x32xf32>,
    } else {
    }
    %c0 = arith.constant 0 : index
    %c0_1 = arith.constant 0 : index
    %3 = vector.load %arg2[%c0, %c0_1] : memref<8x32xf32, #tpu.memory_space<vmem>>, vector<8x32xf32>
    %4 = arith.truncf %3 : vector<8x32xf32> to vector<8x32xbf16>
    %c0_2 = arith.constant 0 : index
    %c0_3 = arith.constant 0 : index
    %5 = vector.load %arg3[%c0_2, %c0_3] : memref<32x64xbf16, #tpu.memory_space<vmem>>, vector<32x64xbf16>
    %cst = arith.constant dense<0.000000e+00> : vector<8x64xf32>
    %6 = tpu.matmul %4, %5, %cst {dimension_numbers = #tpu.dot_dimension_numbers<[1], [0], [0], [1], [0, 0, 1, 1], [], []>} : vector<8x32xbf16>, vector<32x64xbf16>, vector<8x64xf32> -> vector<8x64xf32>
    %c0_4 = arith.constant 0 : index
    %c0_5 = arith.constant 0 : index
    %7 = vector.load %arg4[%c0_4, %c0_5] : memref<1x64xf32, #tpu.memory_space<vmem>>, vector<1x64xf32>
    %8 = vector.broadcast %7 : vector<1x64xf32> to vector<8x64xf32>
    %9 = arith.addf %6, %8 : vector<8x64xf32>
    %cst_6 = arith.constant 0.000000e+00 : f32
    %10 = vector.broadcast %cst_6 : f32 to vector<8x64xf32>
    %11 = arith.maximumf %9, %10 : vector<8x64xf32>
    %c0_7 = arith.constant 0 : index
    %c0_8 = arith.constant 0 : index
    %12 = vector.load %arg9[%c0_7, %c0_8] : memref<8x32xf32, #tpu.memory_space<vmem>>, vector<8x32xf32>
    %13 = arith.truncf %11 : vector<8x64xf32> to vector<8x64xbf16>
    %c0_9 = arith.constant 0 : index
    %c0_10 = arith.constant 0 : index
    %14 = vector.load %arg5[%c0_9, %c0_10] : memref<64x32xbf16, #tpu.memory_space<vmem>>, vector<64x32xbf16>
    %cst_11 = arith.constant dense<0.000000e+00> : vector<8x32xf32>
    %15 = tpu.matmul %13, %14, %cst_11 {dimension_numbers = #tpu.dot_dimension_numbers<[1], [0], [0], [1], [0, 0, 1, 1], [], []>} : vector<8x64xbf16>, vector<64x32xbf16>, vector<8x32xf32> -> vector<8x32xf32>
    %16 = arith.addf %12, %15 : vector<8x32xf32>
    %c0_12 = arith.constant 0 : index
    %c0_13 = arith.constant 0 : index
    %17 = vector.load %arg9[%c0_12, %c0_13] : memref<8x32xf32, #tpu.memory_space<vmem>>, vector<8x32xf32>
    tpu.vector_store %arg9[%c0_12, %c0_13], %16 {strides = array<i32>} : memref<8x32xf32, #tpu.memory_space<vmem>>, vector<8x32xf32>,
    %c0_i32_14 = arith.constant 0 : i32
    %18 = arith.cmpi eq, %arg1, %c0_i32_14 : i32
    %19 = arith.extui %18 : i1 to i32
    %c0_i32_15 = arith.constant 0 : i32
    %20 = arith.cmpi ne, %19, %c0_i32_15 : i32
    scf.if %20 {
      %c0_16 = arith.constant 0 : index
      %c0_17 = arith.constant 0 : index
      %21 = vector.load %arg9[%c0_16, %c0_17] : memref<8x32xf32, #tpu.memory_space<vmem>>, vector<8x32xf32>
      %22 = arith.addf %3, %21 : vector<8x32xf32>
      %c0_18 = arith.constant 0 : index
      %c0_19 = arith.constant 0 : index
      %23 = vector.load %arg6[%c0_18, %c0_19] : memref<1x32xf32, #tpu.memory_space<vmem>>, vector<1x32xf32>
      %24 = vector.broadcast %23 : vector<1x32xf32> to vector<8x32xf32>
      %25 = arith.addf %22, %24 : vector<8x32xf32>
      %cst_20 = arith.constant dense<0.000000e+00> : vector<8xf32>
      %26 = vector.multi_reduction <add>, %25, %cst_20 [1] : vector<8x32xf32> to vector<8xf32>
      %27 = vector.shape_cast %26 : vector<8xf32> to vector<8x1xf32>
      %cst_21 = arith.constant 3.200000e+01 : f32
      %28 = vector.broadcast %cst_21 : f32 to vector<8x1xf32>
      %29 = arith.divf %27, %28 : vector<8x1xf32>
      %30 = vector.broadcast %29 : vector<8x1xf32> to vector<8x32xf32>
      %31 = arith.subf %25, %30 : vector<8x32xf32>
      %32 = arith.mulf %31, %31 : vector<8x32xf32>
      %cst_22 = arith.constant dense<0.000000e+00> : vector<8xf32>
      %33 = vector.multi_reduction <add>, %32, %cst_22 [1] : vector<8x32xf32> to vector<8xf32>
      %34 = vector.shape_cast %33 : vector<8xf32> to vector<8x1xf32>
      %cst_23 = arith.constant 3.200000e+01 : f32
      %35 = vector.broadcast %cst_23 : f32 to vector<8x1xf32>
      %36 = arith.divf %34, %35 : vector<8x1xf32>
      %37 = vector.broadcast %29 : vector<8x1xf32> to vector<8x32xf32>
      %38 = arith.subf %25, %37 : vector<8x32xf32>
      %cst_24 = arith.constant 9.99999974E-6 : f32
      %39 = vector.broadcast %cst_24 : f32 to vector<8x1xf32>
      %40 = arith.addf %36, %39 : vector<8x1xf32>
      %41 = math.rsqrt %40 : vector<8x1xf32>
      %42 = vector.broadcast %41 : vector<8x1xf32> to vector<8x32xf32>
      %43 = arith.mulf %38, %42 : vector<8x32xf32>
      %c0_25 = arith.constant 0 : index
      %c0_26 = arith.constant 0 : index
      %44 = vector.load %arg7[%c0_25, %c0_26] : memref<1x32xf32, #tpu.memory_space<vmem>>, vector<1x32xf32>
      %45 = vector.broadcast %44 : vector<1x32xf32> to vector<8x32xf32>
      %46 = arith.mulf %43, %45 : vector<8x32xf32>
      %c0_27 = arith.constant 0 : index
      %c0_28 = arith.constant 0 : index
      %47 = vector.load %arg8[%c0_27, %c0_28] : memref<1x32xf32, #tpu.memory_space<vmem>>, vector<1x32xf32>
      %48 = vector.broadcast %47 : vector<1x32xf32> to vector<8x32xf32>
      %49 = arith.addf %46, %48 : vector<8x32xf32>
      %c0_29 = arith.constant 0 : index
      %c0_30 = arith.constant 0 : index
      %50 = vector.load %arg9[%c0_29, %c0_30] : memref<8x32xf32, #tpu.memory_space<vmem>>, vector<8x32xf32>
      tpu.vector_store %arg9[%c0_29, %c0_30], %49 {strides = array<i32>} : memref<8x32xf32, #tpu.memory_space<vmem>>, vector<8x32xf32>,
    } else {
    }
    return
  }
  func.func @transform_0(%arg0: i32, %arg1: i32) -> (i32, i32) {
    %c0_i32 = arith.constant 0 : i32
    %c0_i32_0 = arith.constant 0 : i32
    return %arg0, %c0_i32 : i32, i32
  }
  func.func @transform_1(%arg0: i32, %arg1: i32) -> (i32, i32) {
    %c0_i32 = arith.constant 0 : i32
    %c0_i32_0 = arith.constant 0 : i32
    return %c0_i32, %arg1 : i32, i32
  }
  func.func @transform_2(%arg0: i32, %arg1: i32) -> (i32, i32) {
    %c0_i32 = arith.constant 0 : i32
    %c0_i32_0 = arith.constant 0 : i32
    return %c0_i32, %arg1 : i32, i32
  }
  func.func @transform_3(%arg0: i32, %arg1: i32) -> (i32, i32) {
    %c0_i32 = arith.constant 0 : i32
    %c0_i32_0 = arith.constant 0 : i32
    return %arg1, %c0_i32 : i32, i32
  }
  func.func @transform_4(%arg0: i32, %arg1: i32) -> (i32, i32) {
    %c0_i32 = arith.constant 0 : i32
    %c0_i32_0 = arith.constant 0 : i32
    %c0_i32_1 = arith.constant 0 : i32
    return %c0_i32, %c0_i32_0 : i32, i32
  }
  func.func @transform_5(%arg0: i32, %arg1: i32) -> (i32, i32) {
    %c0_i32 = arith.constant 0 : i32
    %c0_i32_0 = arith.constant 0 : i32
    %c0_i32_1 = arith.constant 0 : i32
    return %c0_i32, %c0_i32_0 : i32, i32
  }
  func.func @transform_6(%arg0: i32, %arg1: i32) -> (i32, i32) {
    %c0_i32 = arith.constant 0 : i32
    %c0_i32_0 = arith.constant 0 : i32
    %c0_i32_1 = arith.constant 0 : i32
    return %c0_i32, %c0_i32_0 : i32, i32
  }
  func.func @transform_7(%arg0: i32, %arg1: i32) -> (i32, i32) {
    %c0_i32 = arith.constant 0 : i32
    %c0_i32_0 = arith.constant 0 : i32
    return %arg0, %c0_i32 : i32, i32
  }
}

module attributes {stable_mosaic.version = 11 : i64} {
  func.func @_qkv_kernel(%arg0: i32, %arg1: i32, %arg2: memref<8x32xf32, #tpu.memory_space<vmem>>, %arg3: memref<32x96xbf16, #tpu.memory_space<vmem>>, %arg4: memref<1x96xf32, #tpu.memory_space<vmem>>, %arg5: memref<8x96xbf16, #tpu.memory_space<vmem>>) attributes {dimension_semantics = [#tpu.dimension_semantics<parallel>, #tpu.dimension_semantics<parallel>], iteration_bounds = array<i64: 2, 1>, scalar_prefetch = 0 : i64, scratch_operands = 0 : i64, tpu.core_type = #tpu.core_type<tc>, window_params = [{transform_indices = @transform_0, window_bounds = array<i64: 8, 32>}, {transform_indices = @transform_1, window_bounds = array<i64: 32, 96>}, {transform_indices = @transform_2, window_bounds = array<i64: 1, 96>}, {transform_indices = @transform_3, window_bounds = array<i64: 8, 96>}]} {
    %c0 = arith.constant 0 : index
    %c0_0 = arith.constant 0 : index
    %0 = vector.load %arg2[%c0, %c0_0] : memref<8x32xf32, #tpu.memory_space<vmem>>, vector<8x32xf32>
    %1 = arith.truncf %0 : vector<8x32xf32> to vector<8x32xbf16>
    %c0_1 = arith.constant 0 : index
    %c0_2 = arith.constant 0 : index
    %2 = vector.load %arg3[%c0_1, %c0_2] : memref<32x96xbf16, #tpu.memory_space<vmem>>, vector<32x96xbf16>
    %cst = arith.constant dense<0.000000e+00> : vector<8x96xf32>
    %3 = tpu.matmul %1, %2, %cst {dimension_numbers = #tpu.dot_dimension_numbers<[1], [0], [0], [1], [0, 0, 1, 1], [], []>} : vector<8x32xbf16>, vector<32x96xbf16>, vector<8x96xf32> -> vector<8x96xf32>
    %c0_3 = arith.constant 0 : index
    %c0_4 = arith.constant 0 : index
    %4 = vector.load %arg4[%c0_3, %c0_4] : memref<1x96xf32, #tpu.memory_space<vmem>>, vector<1x96xf32>
    %5 = vector.broadcast %4 : vector<1x96xf32> to vector<8x96xf32>
    %6 = arith.addf %3, %5 : vector<8x96xf32>
    %7 = arith.truncf %6 : vector<8x96xf32> to vector<8x96xbf16>
    %c0_5 = arith.constant 0 : index
    %c0_6 = arith.constant 0 : index
    %8 = vector.load %arg5[%c0_5, %c0_6] : memref<8x96xbf16, #tpu.memory_space<vmem>>, vector<8x96xbf16>
    tpu.vector_store %arg5[%c0_5, %c0_6], %7 {strides = array<i32>} : memref<8x96xbf16, #tpu.memory_space<vmem>>, vector<8x96xbf16>,
    return
  }
  func.func @transform_0(%arg0: i32, %arg1: i32) -> (i32, i32) {
    %c0_i32 = arith.constant 0 : i32
    %c0_i32_0 = arith.constant 0 : i32
    return %arg0, %c0_i32 : i32, i32
  }
  func.func @transform_1(%arg0: i32, %arg1: i32) -> (i32, i32) {
    %c0_i32 = arith.constant 0 : i32
    %c0_i32_0 = arith.constant 0 : i32
    return %c0_i32, %arg1 : i32, i32
  }
  func.func @transform_2(%arg0: i32, %arg1: i32) -> (i32, i32) {
    %c0_i32 = arith.constant 0 : i32
    %c0_i32_0 = arith.constant 0 : i32
    return %c0_i32, %arg1 : i32, i32
  }
  func.func @transform_3(%arg0: i32, %arg1: i32) -> (i32, i32) {
    %c0_i32 = arith.constant 0 : i32
    return %arg0, %arg1 : i32, i32
  }
}

module attributes {stable_mosaic.version = 11 : i64} {
  func.func @_flash_kernel(%arg0: i32, %arg1: i32, %arg2: i32, %arg3: memref<4x8x8xbf16, #tpu.memory_space<vmem>>, %arg4: memref<4x8x8xbf16, #tpu.memory_space<vmem>>, %arg5: memref<4x8x8xbf16, #tpu.memory_space<vmem>>, %arg6: memref<1x1x8xf32, #tpu.memory_space<vmem>>, %arg7: memref<4x8x8xbf16, #tpu.memory_space<vmem>>, %arg8: memref<4x8x1xf32, #tpu.memory_space<vmem>>, %arg9: memref<4x8x1xf32, #tpu.memory_space<vmem>>, %arg10: memref<4x8x8xf32, #tpu.memory_space<vmem>>) attributes {dimension_semantics = [#tpu.dimension_semantics<parallel>, #tpu.dimension_semantics<parallel>, #tpu.dimension_semantics<arbitrary>], iteration_bounds = array<i64: 2, 1, 1>, scalar_prefetch = 0 : i64, scratch_operands = 3 : i64, tpu.core_type = #tpu.core_type<tc>, window_params = [{transform_indices = @transform_0, window_bounds = array<i64: 4, 8, 8>}, {transform_indices = @transform_1, window_bounds = array<i64: 4, 8, 8>}, {transform_indices = @transform_2, window_bounds = array<i64: 4, 8, 8>}, {transform_indices = @transform_3, window_bounds = array<i64: 1, 1, 8>}, {transform_indices = @transform_4, window_bounds = array<i64: 4, 8, 8>}]} {
    %c0_i32 = arith.constant 0 : i32
    %0 = arith.cmpi eq, %arg2, %c0_i32 : i32
    %1 = arith.extui %0 : i1 to i32
    %c0_i32_0 = arith.constant 0 : i32
    %2 = arith.cmpi ne, %1, %c0_i32_0 : i32
    scf.if %2 {
      %cst_38 = arith.constant 0xFF800000 : f32
      %41 = vector.broadcast %cst_38 : f32 to vector<4x8x1xf32>
      %c0_39 = arith.constant 0 : index
      %c0_40 = arith.constant 0 : index
      %c0_41 = arith.constant 0 : index
      %42 = vector.load %arg8[%c0_39, %c0_40, %c0_41] : memref<4x8x1xf32, #tpu.memory_space<vmem>>, vector<4x8x1xf32>
      tpu.vector_store %arg8[%c0_39, %c0_40, %c0_41], %41 {strides = array<i32>} : memref<4x8x1xf32, #tpu.memory_space<vmem>>, vector<4x8x1xf32>,
      %cst_42 = arith.constant 0.000000e+00 : f32
      %43 = vector.broadcast %cst_42 : f32 to vector<4x8x1xf32>
      %c0_43 = arith.constant 0 : index
      %c0_44 = arith.constant 0 : index
      %c0_45 = arith.constant 0 : index
      %44 = vector.load %arg9[%c0_43, %c0_44, %c0_45] : memref<4x8x1xf32, #tpu.memory_space<vmem>>, vector<4x8x1xf32>
      tpu.vector_store %arg9[%c0_43, %c0_44, %c0_45], %43 {strides = array<i32>} : memref<4x8x1xf32, #tpu.memory_space<vmem>>, vector<4x8x1xf32>,
      %cst_46 = arith.constant 0.000000e+00 : f32
      %45 = vector.broadcast %cst_46 : f32 to vector<4x8x8xf32>
      %c0_47 = arith.constant 0 : index
      %c0_48 = arith.constant 0 : index
      %c0_49 = arith.constant 0 : index
      %46 = vector.load %arg10[%c0_47, %c0_48, %c0_49] : memref<4x8x8xf32, #tpu.memory_space<vmem>>, vector<4x8x8xf32>
      tpu.vector_store %arg10[%c0_47, %c0_48, %c0_49], %45 {strides = array<i32>} : memref<4x8x8xf32, #tpu.memory_space<vmem>>, vector<4x8x8xf32>,
    } else {
    }
    %c0 = arith.constant 0 : index
    %c0_1 = arith.constant 0 : index
    %c0_2 = arith.constant 0 : index
    %3 = vector.load %arg3[%c0, %c0_1, %c0_2] : memref<4x8x8xbf16, #tpu.memory_space<vmem>>, vector<4x8x8xbf16>
    %c0_3 = arith.constant 0 : index
    %c0_4 = arith.constant 0 : index
    %c0_5 = arith.constant 0 : index
    %4 = vector.load %arg4[%c0_3, %c0_4, %c0_5] : memref<4x8x8xbf16, #tpu.memory_space<vmem>>, vector<4x8x8xbf16>
    "tpu.trace_start"() <{level = 10 : i32, message = "bqd,bkd->bqk"}> : () -> ()
    %cst = arith.constant dense<0.000000e+00> : vector<4x8x8xf32>
    %5 = tpu.matmul %3, %4, %cst {dimension_numbers = #tpu.dot_dimension_numbers<[2], [2], [1], [1], [0, 0, 0, 1, 1, 1], [0], [0]>} : vector<4x8x8xbf16>, vector<4x8x8xbf16>, vector<4x8x8xf32> -> vector<4x8x8xf32>
    "tpu.trace_stop"() : () -> ()
    %c0_6 = arith.constant 0 : index
    %c0_7 = arith.constant 0 : index
    %c0_8 = arith.constant 0 : index
    %6 = vector.load %arg6[%c0_6, %c0_7, %c0_8] : memref<1x1x8xf32, #tpu.memory_space<vmem>>, vector<1x1x8xf32>
    %7 = vector.shape_cast %6 : vector<1x1x8xf32> to vector<1x1x1x8xf32>
    %8 = vector.shape_cast %7 : vector<1x1x1x8xf32> to vector<1x1x1x8xf32>
    %9 = vector.broadcast %8 : vector<1x1x1x8xf32> to vector<1x4x1x8xf32>
    %10 = vector.shape_cast %9 : vector<1x4x1x8xf32> to vector<4x1x8xf32>
    %11 = vector.broadcast %10 : vector<4x1x8xf32> to vector<4x8x8xf32>
    %12 = arith.addf %5, %11 : vector<4x8x8xf32>
    %c0_9 = arith.constant 0 : index
    %c0_10 = arith.constant 0 : index
    %c0_11 = arith.constant 0 : index
    %13 = vector.load %arg8[%c0_9, %c0_10, %c0_11] : memref<4x8x1xf32, #tpu.memory_space<vmem>>, vector<4x8x1xf32>
    %cst_12 = arith.constant dense<0xFF800000> : vector<4x8xf32>
    %14 = vector.multi_reduction <maximumf>, %12, %cst_12 [2] : vector<4x8x8xf32> to vector<4x8xf32>
    %15 = vector.shape_cast %14 : vector<4x8xf32> to vector<4x8x1xf32>
    %16 = arith.maximumf %13, %15 : vector<4x8x1xf32>
    %c0_13 = arith.constant 0 : index
    %c0_14 = arith.constant 0 : index
    %c0_15 = arith.constant 0 : index
    %17 = vector.load %arg8[%c0_13, %c0_14, %c0_15] : memref<4x8x1xf32, #tpu.memory_space<vmem>>, vector<4x8x1xf32>
    %18 = arith.subf %17, %16 : vector<4x8x1xf32>
    %19 = math.exp %18 : vector<4x8x1xf32>
    %20 = vector.broadcast %16 : vector<4x8x1xf32> to vector<4x8x8xf32>
    %21 = arith.subf %12, %20 : vector<4x8x8xf32>
    %22 = math.exp %21 : vector<4x8x8xf32>
    %c0_16 = arith.constant 0 : index
    %c0_17 = arith.constant 0 : index
    %c0_18 = arith.constant 0 : index
    %23 = vector.load %arg9[%c0_16, %c0_17, %c0_18] : memref<4x8x1xf32, #tpu.memory_space<vmem>>, vector<4x8x1xf32>
    %24 = arith.mulf %19, %23 : vector<4x8x1xf32>
    %cst_19 = arith.constant dense<0.000000e+00> : vector<4x8xf32>
    %25 = vector.multi_reduction <add>, %22, %cst_19 [2] : vector<4x8x8xf32> to vector<4x8xf32>
    %26 = vector.shape_cast %25 : vector<4x8xf32> to vector<4x8x1xf32>
    %27 = arith.addf %24, %26 : vector<4x8x1xf32>
    %c0_20 = arith.constant 0 : index
    %c0_21 = arith.constant 0 : index
    %c0_22 = arith.constant 0 : index
    %28 = vector.load %arg9[%c0_20, %c0_21, %c0_22] : memref<4x8x1xf32, #tpu.memory_space<vmem>>, vector<4x8x1xf32>
    tpu.vector_store %arg9[%c0_20, %c0_21, %c0_22], %27 {strides = array<i32>} : memref<4x8x1xf32, #tpu.memory_space<vmem>>, vector<4x8x1xf32>,
    %c0_23 = arith.constant 0 : index
    %c0_24 = arith.constant 0 : index
    %c0_25 = arith.constant 0 : index
    %29 = vector.load %arg10[%c0_23, %c0_24, %c0_25] : memref<4x8x8xf32, #tpu.memory_space<vmem>>, vector<4x8x8xf32>
    %30 = vector.broadcast %19 : vector<4x8x1xf32> to vector<4x8x8xf32>
    %31 = arith.mulf %30, %29 : vector<4x8x8xf32>
    %32 = arith.truncf %22 : vector<4x8x8xf32> to vector<4x8x8xbf16>
    %c0_26 = arith.constant 0 : index
    %c0_27 = arith.constant 0 : index
    %c0_28 = arith.constant 0 : index
    %33 = vector.load %arg5[%c0_26, %c0_27, %c0_28] : memref<4x8x8xbf16, #tpu.memory_space<vmem>>, vector<4x8x8xbf16>
    "tpu.trace_start"() <{level = 10 : i32, message = "bqk,bkd->bqd"}> : () -> ()
    %cst_29 = arith.constant dense<0.000000e+00> : vector<4x8x8xf32>
    %34 = tpu.matmul %32, %33, %cst_29 {dimension_numbers = #tpu.dot_dimension_numbers<[2], [1], [1], [2], [0, 0, 0, 1, 1, 2], [0], [0]>} : vector<4x8x8xbf16>, vector<4x8x8xbf16>, vector<4x8x8xf32> -> vector<4x8x8xf32>
    "tpu.trace_stop"() : () -> ()
    %35 = arith.addf %31, %34 : vector<4x8x8xf32>
    %c0_30 = arith.constant 0 : index
    %c0_31 = arith.constant 0 : index
    %c0_32 = arith.constant 0 : index
    %36 = vector.load %arg10[%c0_30, %c0_31, %c0_32] : memref<4x8x8xf32, #tpu.memory_space<vmem>>, vector<4x8x8xf32>
    tpu.vector_store %arg10[%c0_30, %c0_31, %c0_32], %35 {strides = array<i32>} : memref<4x8x8xf32, #tpu.memory_space<vmem>>, vector<4x8x8xf32>,
    %c0_33 = arith.constant 0 : index
    %c0_34 = arith.constant 0 : index
    %c0_35 = arith.constant 0 : index
    %37 = vector.load %arg8[%c0_33, %c0_34, %c0_35] : memref<4x8x1xf32, #tpu.memory_space<vmem>>, vector<4x8x1xf32>
    tpu.vector_store %arg8[%c0_33, %c0_34, %c0_35], %16 {strides = array<i32>} : memref<4x8x1xf32, #tpu.memory_space<vmem>>, vector<4x8x1xf32>,
    %c0_i32_36 = arith.constant 0 : i32
    %38 = arith.cmpi eq, %arg2, %c0_i32_36 : i32
    %39 = arith.extui %38 : i1 to i32
    %c0_i32_37 = arith.constant 0 : i32
    %40 = arith.cmpi ne, %39, %c0_i32_37 : i32
    scf.if %40 {
      %c0_38 = arith.constant 0 : index
      %c0_39 = arith.constant 0 : index
      %c0_40 = arith.constant 0 : index
      %41 = vector.load %arg9[%c0_38, %c0_39, %c0_40] : memref<4x8x1xf32, #tpu.memory_space<vmem>>, vector<4x8x1xf32>
      %42 = tpu.reciprocal %41 {approx = true} : vector<4x8x1xf32> -> vector<4x8x1xf32>
      %c0_41 = arith.constant 0 : index
      %c0_42 = arith.constant 0 : index
      %c0_43 = arith.constant 0 : index
      %43 = vector.load %arg10[%c0_41, %c0_42, %c0_43] : memref<4x8x8xf32, #tpu.memory_space<vmem>>, vector<4x8x8xf32>
      %44 = vector.broadcast %42 : vector<4x8x1xf32> to vector<4x8x8xf32>
      %45 = arith.mulf %43, %44 : vector<4x8x8xf32>
      %46 = arith.truncf %45 : vector<4x8x8xf32> to vector<4x8x8xbf16>
      %c0_44 = arith.constant 0 : index
      %c0_45 = arith.constant 0 : index
      %c0_46 = arith.constant 0 : index
      %47 = vector.load %arg7[%c0_44, %c0_45, %c0_46] : memref<4x8x8xbf16, #tpu.memory_space<vmem>>, vector<4x8x8xbf16>
      tpu.vector_store %arg7[%c0_44, %c0_45, %c0_46], %46 {strides = array<i32>} : memref<4x8x8xbf16, #tpu.memory_space<vmem>>, vector<4x8x8xbf16>,
    } else {
    }
    return
  }
  func.func @transform_0(%arg0: i32, %arg1: i32, %arg2: i32) -> (i32, i32, i32) {
    %c0_i32 = arith.constant 0 : i32
    %c0_i32_0 = arith.constant 0 : i32
    return %arg0, %arg1, %c0_i32 : i32, i32, i32
  }
  func.func @transform_1(%arg0: i32, %arg1: i32, %arg2: i32) -> (i32, i32, i32) {
    %c0_i32 = arith.constant 0 : i32
    %c0_i32_0 = arith.constant 0 : i32
    return %arg0, %arg2, %c0_i32 : i32, i32, i32
  }
  func.func @transform_2(%arg0: i32, %arg1: i32, %arg2: i32) -> (i32, i32, i32) {
    %c0_i32 = arith.constant 0 : i32
    %c0_i32_0 = arith.constant 0 : i32
    return %arg0, %arg2, %c0_i32 : i32, i32, i32
  }
  func.func @transform_3(%arg0: i32, %arg1: i32, %arg2: i32) -> (i32, i32, i32) {
    %c0_i32 = arith.constant 0 : i32
    %c0_i32_0 = arith.constant 0 : i32
    return %arg0, %c0_i32, %arg2 : i32, i32, i32
  }
  func.func @transform_4(%arg0: i32, %arg1: i32, %arg2: i32) -> (i32, i32, i32) {
    %c0_i32 = arith.constant 0 : i32
    %c0_i32_0 = arith.constant 0 : i32
    return %arg0, %arg1, %c0_i32 : i32, i32, i32
  }
}

module attributes {stable_mosaic.version = 11 : i64} {
  func.func @_outproj_ln_kernel(%arg0: i32, %arg1: memref<8x32xf32, #tpu.memory_space<vmem>>, %arg2: memref<8x32xbf16, #tpu.memory_space<vmem>>, %arg3: memref<32x32xbf16, #tpu.memory_space<vmem>>, %arg4: memref<1x32xf32, #tpu.memory_space<vmem>>, %arg5: memref<1x32xf32, #tpu.memory_space<vmem>>, %arg6: memref<1x32xf32, #tpu.memory_space<vmem>>, %arg7: memref<8x32xf32, #tpu.memory_space<vmem>>) attributes {dimension_semantics = [#tpu.dimension_semantics<parallel>], iteration_bounds = array<i64: 2>, scalar_prefetch = 0 : i64, scratch_operands = 0 : i64, tpu.core_type = #tpu.core_type<tc>, window_params = [{transform_indices = @transform_0, window_bounds = array<i64: 8, 32>}, {transform_indices = @transform_1, window_bounds = array<i64: 8, 32>}, {pipeline_mode = #tpu.pipeline_mode<synchronous>, transform_indices = @transform_2, window_bounds = array<i64: 32, 32>}, {pipeline_mode = #tpu.pipeline_mode<synchronous>, transform_indices = @transform_3, window_bounds = array<i64: 1, 32>}, {pipeline_mode = #tpu.pipeline_mode<synchronous>, transform_indices = @transform_4, window_bounds = array<i64: 1, 32>}, {pipeline_mode = #tpu.pipeline_mode<synchronous>, transform_indices = @transform_5, window_bounds = array<i64: 1, 32>}, {transform_indices = @transform_6, window_bounds = array<i64: 8, 32>}]} {
    %c0 = arith.constant 0 : index
    %c0_0 = arith.constant 0 : index
    %0 = vector.load %arg1[%c0, %c0_0] : memref<8x32xf32, #tpu.memory_space<vmem>>, vector<8x32xf32>
    %c0_1 = arith.constant 0 : index
    %c0_2 = arith.constant 0 : index
    %1 = vector.load %arg2[%c0_1, %c0_2] : memref<8x32xbf16, #tpu.memory_space<vmem>>, vector<8x32xbf16>
    %c0_3 = arith.constant 0 : index
    %c0_4 = arith.constant 0 : index
    %2 = vector.load %arg3[%c0_3, %c0_4] : memref<32x32xbf16, #tpu.memory_space<vmem>>, vector<32x32xbf16>
    %cst = arith.constant dense<0.000000e+00> : vector<8x32xf32>
    %3 = tpu.matmul %1, %2, %cst {dimension_numbers = #tpu.dot_dimension_numbers<[1], [0], [0], [1], [0, 0, 1, 1], [], []>} : vector<8x32xbf16>, vector<32x32xbf16>, vector<8x32xf32> -> vector<8x32xf32>
    %4 = arith.addf %0, %3 : vector<8x32xf32>
    %c0_5 = arith.constant 0 : index
    %c0_6 = arith.constant 0 : index
    %5 = vector.load %arg4[%c0_5, %c0_6] : memref<1x32xf32, #tpu.memory_space<vmem>>, vector<1x32xf32>
    %6 = vector.broadcast %5 : vector<1x32xf32> to vector<8x32xf32>
    %7 = arith.addf %4, %6 : vector<8x32xf32>
    %cst_7 = arith.constant dense<0.000000e+00> : vector<8xf32>
    %8 = vector.multi_reduction <add>, %7, %cst_7 [1] : vector<8x32xf32> to vector<8xf32>
    %9 = vector.shape_cast %8 : vector<8xf32> to vector<8x1xf32>
    %cst_8 = arith.constant 3.200000e+01 : f32
    %10 = vector.broadcast %cst_8 : f32 to vector<8x1xf32>
    %11 = arith.divf %9, %10 : vector<8x1xf32>
    %12 = vector.broadcast %11 : vector<8x1xf32> to vector<8x32xf32>
    %13 = arith.subf %7, %12 : vector<8x32xf32>
    %14 = arith.mulf %13, %13 : vector<8x32xf32>
    %cst_9 = arith.constant dense<0.000000e+00> : vector<8xf32>
    %15 = vector.multi_reduction <add>, %14, %cst_9 [1] : vector<8x32xf32> to vector<8xf32>
    %16 = vector.shape_cast %15 : vector<8xf32> to vector<8x1xf32>
    %cst_10 = arith.constant 3.200000e+01 : f32
    %17 = vector.broadcast %cst_10 : f32 to vector<8x1xf32>
    %18 = arith.divf %16, %17 : vector<8x1xf32>
    %19 = vector.broadcast %11 : vector<8x1xf32> to vector<8x32xf32>
    %20 = arith.subf %7, %19 : vector<8x32xf32>
    %cst_11 = arith.constant 9.99999974E-6 : f32
    %21 = vector.broadcast %cst_11 : f32 to vector<8x1xf32>
    %22 = arith.addf %18, %21 : vector<8x1xf32>
    %23 = math.rsqrt %22 : vector<8x1xf32>
    %24 = vector.broadcast %23 : vector<8x1xf32> to vector<8x32xf32>
    %25 = arith.mulf %20, %24 : vector<8x32xf32>
    %c0_12 = arith.constant 0 : index
    %c0_13 = arith.constant 0 : index
    %26 = vector.load %arg5[%c0_12, %c0_13] : memref<1x32xf32, #tpu.memory_space<vmem>>, vector<1x32xf32>
    %27 = vector.broadcast %26 : vector<1x32xf32> to vector<8x32xf32>
    %28 = arith.mulf %25, %27 : vector<8x32xf32>
    %c0_14 = arith.constant 0 : index
    %c0_15 = arith.constant 0 : index
    %29 = vector.load %arg6[%c0_14, %c0_15] : memref<1x32xf32, #tpu.memory_space<vmem>>, vector<1x32xf32>
    %30 = vector.broadcast %29 : vector<1x32xf32> to vector<8x32xf32>
    %31 = arith.addf %28, %30 : vector<8x32xf32>
    %c0_16 = arith.constant 0 : index
    %c0_17 = arith.constant 0 : index
    %32 = vector.load %arg7[%c0_16, %c0_17] : memref<8x32xf32, #tpu.memory_space<vmem>>, vector<8x32xf32>
    tpu.vector_store %arg7[%c0_16, %c0_17], %31 {strides = array<i32>} : memref<8x32xf32, #tpu.memory_space<vmem>>, vector<8x32xf32>,
    return
  }
  func.func @transform_0(%arg0: i32) -> (i32, i32) {
    %c0_i32 = arith.constant 0 : i32
    %c0_i32_0 = arith.constant 0 : i32
    return %arg0, %c0_i32 : i32, i32
  }
  func.func @transform_1(%arg0: i32) -> (i32, i32) {
    %c0_i32 = arith.constant 0 : i32
    %c0_i32_0 = arith.constant 0 : i32
    return %arg0, %c0_i32 : i32, i32
  }
  func.func @transform_2(%arg0: i32) -> (i32, i32) {
    %c0_i32 = arith.constant 0 : i32
    %c0_i32_0 = arith.constant 0 : i32
    %c0_i32_1 = arith.constant 0 : i32
    return %c0_i32, %c0_i32_0 : i32, i32
  }
  func.func @transform_3(%arg0: i32) -> (i32, i32) {
    %c0_i32 = arith.constant 0 : i32
    %c0_i32_0 = arith.constant 0 : i32
    %c0_i32_1 = arith.constant 0 : i32
    return %c0_i32, %c0_i32_0 : i32, i32
  }
  func.func @transform_4(%arg0: i32) -> (i32, i32) {
    %c0_i32 = arith.constant 0 : i32
    %c0_i32_0 = arith.constant 0 : i32
    %c0_i32_1 = arith.constant 0 : i32
    return %c0_i32, %c0_i32_0 : i32, i32
  }
  func.func @transform_5(%arg0: i32) -> (i32, i32) {
    %c0_i32 = arith.constant 0 : i32
    %c0_i32_0 = arith.constant 0 : i32
    %c0_i32_1 = arith.constant 0 : i32
    return %c0_i32, %c0_i32_0 : i32, i32
  }
  func.func @transform_6(%arg0: i32) -> (i32, i32) {
    %c0_i32 = arith.constant 0 : i32
    %c0_i32_0 = arith.constant 0 : i32
    return %arg0, %c0_i32 : i32, i32
  }
}

module attributes {stable_mosaic.version = 11 : i64} {
  func.func @_ffn_ln_kernel(%arg0: i32, %arg1: i32, %arg2: memref<8x32xf32, #tpu.memory_space<vmem>>, %arg3: memref<32x64xbf16, #tpu.memory_space<vmem>>, %arg4: memref<1x64xf32, #tpu.memory_space<vmem>>, %arg5: memref<64x32xbf16, #tpu.memory_space<vmem>>, %arg6: memref<1x32xf32, #tpu.memory_space<vmem>>, %arg7: memref<1x32xf32, #tpu.memory_space<vmem>>, %arg8: memref<1x32xf32, #tpu.memory_space<vmem>>, %arg9: memref<8x32xf32, #tpu.memory_space<vmem>>) attributes {dimension_semantics = [#tpu.dimension_semantics<parallel>, #tpu.dimension_semantics<arbitrary>], iteration_bounds = array<i64: 2, 1>, scalar_prefetch = 0 : i64, scratch_operands = 0 : i64, tpu.core_type = #tpu.core_type<tc>, window_params = [{transform_indices = @transform_0, window_bounds = array<i64: 8, 32>}, {transform_indices = @transform_1, window_bounds = array<i64: 32, 64>}, {transform_indices = @transform_2, window_bounds = array<i64: 1, 64>}, {transform_indices = @transform_3, window_bounds = array<i64: 64, 32>}, {pipeline_mode = #tpu.pipeline_mode<synchronous>, transform_indices = @transform_4, window_bounds = array<i64: 1, 32>}, {pipeline_mode = #tpu.pipeline_mode<synchronous>, transform_indices = @transform_5, window_bounds = array<i64: 1, 32>}, {pipeline_mode = #tpu.pipeline_mode<synchronous>, transform_indices = @transform_6, window_bounds = array<i64: 1, 32>}, {transform_indices = @transform_7, window_bounds = array<i64: 8, 32>}]} {
    %c0_i32 = arith.constant 0 : i32
    %0 = arith.cmpi eq, %arg1, %c0_i32 : i32
    %1 = arith.extui %0 : i1 to i32
    %c0_i32_0 = arith.constant 0 : i32
    %2 = arith.cmpi ne, %1, %c0_i32_0 : i32
    scf.if %2 {
      %cst_16 = arith.constant 0.000000e+00 : f32
      %21 = vector.broadcast %cst_16 : f32 to vector<8x32xf32>
      %c0_17 = arith.constant 0 : index
      %c0_18 = arith.constant 0 : index
      %22 = vector.load %arg9[%c0_17, %c0_18] : memref<8x32xf32, #tpu.memory_space<vmem>>, vector<8x32xf32>
      tpu.vector_store %arg9[%c0_17, %c0_18], %21 {strides = array<i32>} : memref<8x32xf32, #tpu.memory_space<vmem>>, vector<8x32xf32>,
    } else {
    }
    %c0 = arith.constant 0 : index
    %c0_1 = arith.constant 0 : index
    %3 = vector.load %arg2[%c0, %c0_1] : memref<8x32xf32, #tpu.memory_space<vmem>>, vector<8x32xf32>
    %4 = arith.truncf %3 : vector<8x32xf32> to vector<8x32xbf16>
    %c0_2 = arith.constant 0 : index
    %c0_3 = arith.constant 0 : index
    %5 = vector.load %arg3[%c0_2, %c0_3] : memref<32x64xbf16, #tpu.memory_space<vmem>>, vector<32x64xbf16>
    %cst = arith.constant dense<0.000000e+00> : vector<8x64xf32>
    %6 = tpu.matmul %4, %5, %cst {dimension_numbers = #tpu.dot_dimension_numbers<[1], [0], [0], [1], [0, 0, 1, 1], [], []>} : vector<8x32xbf16>, vector<32x64xbf16>, vector<8x64xf32> -> vector<8x64xf32>
    %c0_4 = arith.constant 0 : index
    %c0_5 = arith.constant 0 : index
    %7 = vector.load %arg4[%c0_4, %c0_5] : memref<1x64xf32, #tpu.memory_space<vmem>>, vector<1x64xf32>
    %8 = vector.broadcast %7 : vector<1x64xf32> to vector<8x64xf32>
    %9 = arith.addf %6, %8 : vector<8x64xf32>
    %cst_6 = arith.constant 0.000000e+00 : f32
    %10 = vector.broadcast %cst_6 : f32 to vector<8x64xf32>
    %11 = arith.maximumf %9, %10 : vector<8x64xf32>
    %c0_7 = arith.constant 0 : index
    %c0_8 = arith.constant 0 : index
    %12 = vector.load %arg9[%c0_7, %c0_8] : memref<8x32xf32, #tpu.memory_space<vmem>>, vector<8x32xf32>
    %13 = arith.truncf %11 : vector<8x64xf32> to vector<8x64xbf16>
    %c0_9 = arith.constant 0 : index
    %c0_10 = arith.constant 0 : index
    %14 = vector.load %arg5[%c0_9, %c0_10] : memref<64x32xbf16, #tpu.memory_space<vmem>>, vector<64x32xbf16>
    %cst_11 = arith.constant dense<0.000000e+00> : vector<8x32xf32>
    %15 = tpu.matmul %13, %14, %cst_11 {dimension_numbers = #tpu.dot_dimension_numbers<[1], [0], [0], [1], [0, 0, 1, 1], [], []>} : vector<8x64xbf16>, vector<64x32xbf16>, vector<8x32xf32> -> vector<8x32xf32>
    %16 = arith.addf %12, %15 : vector<8x32xf32>
    %c0_12 = arith.constant 0 : index
    %c0_13 = arith.constant 0 : index
    %17 = vector.load %arg9[%c0_12, %c0_13] : memref<8x32xf32, #tpu.memory_space<vmem>>, vector<8x32xf32>
    tpu.vector_store %arg9[%c0_12, %c0_13], %16 {strides = array<i32>} : memref<8x32xf32, #tpu.memory_space<vmem>>, vector<8x32xf32>,
    %c0_i32_14 = arith.constant 0 : i32
    %18 = arith.cmpi eq, %arg1, %c0_i32_14 : i32
    %19 = arith.extui %18 : i1 to i32
    %c0_i32_15 = arith.constant 0 : i32
    %20 = arith.cmpi ne, %19, %c0_i32_15 : i32
    scf.if %20 {
      %c0_16 = arith.constant 0 : index
      %c0_17 = arith.constant 0 : index
      %21 = vector.load %arg9[%c0_16, %c0_17] : memref<8x32xf32, #tpu.memory_space<vmem>>, vector<8x32xf32>
      %22 = arith.addf %3, %21 : vector<8x32xf32>
      %c0_18 = arith.constant 0 : index
      %c0_19 = arith.constant 0 : index
      %23 = vector.load %arg6[%c0_18, %c0_19] : memref<1x32xf32, #tpu.memory_space<vmem>>, vector<1x32xf32>
      %24 = vector.broadcast %23 : vector<1x32xf32> to vector<8x32xf32>
      %25 = arith.addf %22, %24 : vector<8x32xf32>
      %cst_20 = arith.constant dense<0.000000e+00> : vector<8xf32>
      %26 = vector.multi_reduction <add>, %25, %cst_20 [1] : vector<8x32xf32> to vector<8xf32>
      %27 = vector.shape_cast %26 : vector<8xf32> to vector<8x1xf32>
      %cst_21 = arith.constant 3.200000e+01 : f32
      %28 = vector.broadcast %cst_21 : f32 to vector<8x1xf32>
      %29 = arith.divf %27, %28 : vector<8x1xf32>
      %30 = vector.broadcast %29 : vector<8x1xf32> to vector<8x32xf32>
      %31 = arith.subf %25, %30 : vector<8x32xf32>
      %32 = arith.mulf %31, %31 : vector<8x32xf32>
      %cst_22 = arith.constant dense<0.000000e+00> : vector<8xf32>
      %33 = vector.multi_reduction <add>, %32, %cst_22 [1] : vector<8x32xf32> to vector<8xf32>
      %34 = vector.shape_cast %33 : vector<8xf32> to vector<8x1xf32>
      %cst_23 = arith.constant 3.200000e+01 : f32
      %35 = vector.broadcast %cst_23 : f32 to vector<8x1xf32>
      %36 = arith.divf %34, %35 : vector<8x1xf32>
      %37 = vector.broadcast %29 : vector<8x1xf32> to vector<8x32xf32>
      %38 = arith.subf %25, %37 : vector<8x32xf32>
      %cst_24 = arith.constant 9.99999974E-6 : f32
      %39 = vector.broadcast %cst_24 : f32 to vector<8x1xf32>
      %40 = arith.addf %36, %39 : vector<8x1xf32>
      %41 = math.rsqrt %40 : vector<8x1xf32>
      %42 = vector.broadcast %41 : vector<8x1xf32> to vector<8x32xf32>
      %43 = arith.mulf %38, %42 : vector<8x32xf32>
      %c0_25 = arith.constant 0 : index
      %c0_26 = arith.constant 0 : index
      %44 = vector.load %arg7[%c0_25, %c0_26] : memref<1x32xf32, #tpu.memory_space<vmem>>, vector<1x32xf32>
      %45 = vector.broadcast %44 : vector<1x32xf32> to vector<8x32xf32>
      %46 = arith.mulf %43, %45 : vector<8x32xf32>
      %c0_27 = arith.constant 0 : index
      %c0_28 = arith.constant 0 : index
      %47 = vector.load %arg8[%c0_27, %c0_28] : memref<1x32xf32, #tpu.memory_space<vmem>>, vector<1x32xf32>
      %48 = vector.broadcast %47 : vector<1x32xf32> to vector<8x32xf32>
      %49 = arith.addf %46, %48 : vector<8x32xf32>
      %c0_29 = arith.constant 0 : index
      %c0_30 = arith.constant 0 : index
      %50 = vector.load %arg9[%c0_29, %c0_30] : memref<8x32xf32, #tpu.memory_space<vmem>>, vector<8x32xf32>
      tpu.vector_store %arg9[%c0_29, %c0_30], %49 {strides = array<i32>} : memref<8x32xf32, #tpu.memory_space<vmem>>, vector<8x32xf32>,
    } else {
    }
    return
  }
  func.func @transform_0(%arg0: i32, %arg1: i32) -> (i32, i32) {
    %c0_i32 = arith.constant 0 : i32
    %c0_i32_0 = arith.constant 0 : i32
    return %arg0, %c0_i32 : i32, i32
  }
  func.func @transform_1(%arg0: i32, %arg1: i32) -> (i32, i32) {
    %c0_i32 = arith.constant 0 : i32
    %c0_i32_0 = arith.constant 0 : i32
    return %c0_i32, %arg1 : i32, i32
  }
  func.func @transform_2(%arg0: i32, %arg1: i32) -> (i32, i32) {
    %c0_i32 = arith.constant 0 : i32
    %c0_i32_0 = arith.constant 0 : i32
    return %c0_i32, %arg1 : i32, i32
  }
  func.func @transform_3(%arg0: i32, %arg1: i32) -> (i32, i32) {
    %c0_i32 = arith.constant 0 : i32
    %c0_i32_0 = arith.constant 0 : i32
    return %arg1, %c0_i32 : i32, i32
  }
  func.func @transform_4(%arg0: i32, %arg1: i32) -> (i32, i32) {
    %c0_i32 = arith.constant 0 : i32
    %c0_i32_0 = arith.constant 0 : i32
    %c0_i32_1 = arith.constant 0 : i32
    return %c0_i32, %c0_i32_0 : i32, i32
  }
  func.func @transform_5(%arg0: i32, %arg1: i32) -> (i32, i32) {
    %c0_i32 = arith.constant 0 : i32
    %c0_i32_0 = arith.constant 0 : i32
    %c0_i32_1 = arith.constant 0 : i32
    return %c0_i32, %c0_i32_0 : i32, i32
  }
  func.func @transform_6(%arg0: i32, %arg1: i32) -> (i32, i32) {
    %c0_i32 = arith.constant 0 : i32
    %c0_i32_0 = arith.constant 0 : i32
    %c0_i32_1 = arith.constant 0 : i32
    return %c0_i32, %c0_i32_0 : i32, i32
  }
  func.func @transform_7(%arg0: i32, %arg1: i32) -> (i32, i32) {
    %c0_i32 = arith.constant 0 : i32
    %c0_i32_0 = arith.constant 0 : i32
    return %arg0, %c0_i32 : i32, i32
  }
}

</mosaic_0001>

<bundles_post_ra>
// kernel: man_encoder_layer.6
= control target key start
LH: loop header
LB: loop body
LE: loop exit
PB: predicated region body
PF: predicated region fallthrough
CT: control target
= control target key end

     0   :  { %s450_s12 = smov 0   ;;  %s452_s13 = smov 0   ;;  %s489_s0 = inlined_call_operand.vmem [shape: f32[16,32], index: 0, kind: input, shape index: {}]   ;;  %s490_s1 = inlined_call_operand.vmem [shape: bf16[32,96], index: 1, kind: input, shape index: {}]   ;;  %s491_s2 = inlined_call_operand.vmem [shape: f32[1,96], index: 2, kind: input, shape index: {}]   ;;  %s492_s3 = inlined_call_operand.vmem [shape: bf16[16,96], index: 3, kind: output, shape index: {}]  }
   0x1   :  { %s454_s14 = smov 0  }
   0x2 LB: > { %s25_s15 = sadd.s32 1, %s424_s13  ;;  %p365_p0 = scmp.ge.s32.totalorder %s428_s14, 1  ;;  %s428_s14 = sphi %s454_s14, %s13_s14   ;;  %s424_s13 = sphi %s452_s13, %s494_s13   ;;  %s420_s12 = sphi %s450_s12, %s493_s12  }
   0x3   : > { %p27_p1 = scmp.ge.s32.totalorder %s25_s15, 2  ;;  %p167_p2 = scmp.lt.s32.totalorder %s428_s14, 3 }
   0x5   : > { %s496_s15 = smov (%p27_p1, %s25_s15), 0  ;;  %p168_p3 = pnand %p365_p0, %p167_p2 }
   0x6   : > { %p199_p4 = scmp.lt.s32.totalorder (!%p168_p3), %s420_s12, 1 }
   0x7   : > { %171 = sbr.rel (%p168_p3) target bundleno = 154 (0x9a), region = 32 }
   0xc   : > { %v380_v0 = vld [vmem:[%s490_s1 + $0x8] sm:$0xff]  ;;  %v379_v1 = vld [vmem:[%s490_s1] sm:$0xff]  ;;  %s498_s12 = smov (!%p199_p4, %s420_s12), 1  ;;  %vm240_vm0 = vcmask 261120   ;;  %vm258_vm1 = vcmask 781312  }
   0xd   : > { %250 = vmatpush.bf16.msra.mxu0 %v380_v0  ;;  %s366_s20 = sshll.u32 %s498_s12, 3  ;;  %v405_v4 = vld [vmem:[%s491_s2] ss:$0 sm:$0xff]  ;;  %s367_s26 = sshll.u32 %s498_s12, 2 }
   0xe   : > { %s202_s23 = scalar_lea.vmem %s489_s0, %s366_s20  ;;  %s216_s29 = scalar_lea.vmem %s492_s3, %s367_s26 }
   0xf   : > { %v218_v2 = vld [vmem:[%s202_s23] sm:$0xff] }
  0x10   : > { %v219_v3 = vpack.c.bf16 %v218_v2, %v218_v2 }
  0x11   : > { %251 = vmatpush.bf16.msra.mxu0 %v379_v1 }
  0x14   : > { %376 = vmatmul.msk.bf16.vlgmr.msra.gmra.mxu0 %vm240_vm0, %v219_v3 }
  0x91   : > { %v253_v5 = vpop.f32.mrf.mxu0 }
  0x92   : > { %v254_v6 = vadd.f32 %v405_v4, %v253_v5 }
  0x94   : > { %v257_v7 = vpack.c.bf16 %v254_v6, %v254_v6 }
  0x96   : > { %259 = vst.msk [vmem:[%s216_s29] sm:$0xf] %vm258_vm1, %v257_v7 }
  0x99   : > { %v255_v8 = vpop.f32.mrf.mxu0 }
  0x9a PF: > { %s13_s14 = sadd.s32 1, %s428_s14   ;;  %s493_s12 = smov %s424_s13 }
  0x9b   : > { %p10_p5 = scmp.ge.s32.totalorder %s13_s14, 4   ;;  %s494_s13 = smov %s496_s15 }
  0x9d   :  { %12 = sbr.rel (!%p10_p5) target bundleno = 2 (0x2), region = 68 }

// kernel: man_encoder_layer.5
= control target key start
LH: loop header
LB: loop body
LE: loop exit
PB: predicated region body
PF: predicated region fallthrough
CT: control target
= control target key end

     0   :  { %s737_s24 = smov 0   ;;  %s739_s25 = smov 0   ;;  %s813_s0 = inlined_call_operand.vmem [shape: f32[16,32], index: 0, kind: input, shape index: {}]   ;;  %s814_s1 = inlined_call_operand.vmem [shape: bf16[32,64], index: 1, kind: input, shape index: {}]   ;;  %s815_s2 = inlined_call_operand.vmem [shape: f32[1,64], index: 2, kind: input, shape index: {}]   ;;  %s816_s3 = inlined_call_operand.vmem [shape: bf16[64,32], index: 3, kind: input, shape index: {}]   ;;  %s817_s4 = inlined_call_operand.vmem [shape: f32[1,32], index: 4, kind: input, shape index: {}]   ;;  %s818_s5 = inlined_call_operand.vmem [shape: f32[1,32], index: 5, kind: input, shape index: {}]   ;;  %s819_s6 = inlined_call_operand.vmem [shape: f32[1,32], index: 6, kind: input, shape index: {}]   ;;  %s820_s7 = inlined_call_operand.vmem [shape: f32[16,32], index: 7, kind: output, shape index: {}]  }
   0x1   :  { %s741_s26 = smov 0  }
   0x2 LB: > { %s29_s27 = sadd.s32 1, %s689_s25  ;;  %p600_p0 = scmp.ge.s32.totalorder %s693_s26, 1  ;;  %s693_s26 = sphi %s741_s26, %s17_s26   ;;  %s689_s25 = sphi %s739_s25, %s822_s25   ;;  %s685_s24 = sphi %s737_s24, %s821_s24  }
   0x3   : > { %p31_p1 = scmp.ge.s32.totalorder %s29_s27, 2  ;;  %p276_p2 = scmp.lt.s32.totalorder %s693_s26, 3 }
   0x5   : > { %s824_s27 = smov (%p31_p1, %s29_s27), 0  ;;  %p277_p3 = pnand %p600_p0, %p276_p2 }
   0x6   : > { %p318_p4 = scmp.lt.s32.totalorder (!%p277_p3), %s685_s24, 1 }
   0x7   : > { %280 = sbr.rel (%p277_p3) target bundleno = 561 (0x231), region = 48 }
   0xc   : > { %v632_v0 = vld [vmem:[%s814_s1 + $0x8] sm:$0xff]  ;;  %v636_v1 = vld [vmem:[%s816_s3 + $0x18] sm:$0xff]  ;;  %v631_v2 = vld [vmem:[%s814_s1] sm:$0xff]  ;;  %s826_s24 = smov (!%p318_p4, %s685_s24), 1  ;;  %vm344_vm0 = vcmask 261120   ;;  %v695_v4 = vmov 0.0  }
   0xd   : > { %378 = vmatpush.bf16.msra.mxu0 %v632_v0  ;;  %428 = vmatpush.bf16.msra.mxu1 %v636_v1  ;;  %v635_v3 = vld [vmem:[%s816_s3 + $0x10] sm:$0xff]  ;;  %s601_s13 = sshll.u32 %s826_s24, 3  ;;  %v634_v7 = vld [vmem:[%s816_s3 + $0x8] sm:$0xff]  ;;  %v633_v8 = vld [vmem:[%s816_s3] sm:$0xff]  ;;  %vm420_vm1 = vcmask 523264   ;;  %v696_v24 = vmov 32.0  }
   0xe   : > { %s321_s16 = scalar_lea.vmem %s813_s0, %s601_s13  ;;  %s773_s19 = scalar_lea.vmem %s820_s7, %s601_s13  ;;  %v663_v9 = vld [vmem:[%s815_s2] ss:$0 sm:$0xff]  ;;  %667 = vrcp.f32 %v696_v24 }
   0xf   : > { %345 = vst.msk [vmem:[%s773_s19] sm:$0xff] %vm344_vm0, %v695_v4  ;;  %v346_v5 = vld [vmem:[%s321_s16] sm:$0xff] }
  0x10   : > { %v347_v6 = vpack.c.bf16 %v346_v5, %v346_v5  ;;  %v664_v19 = vld [vmem:[%s817_s4] ss:$0 sm:$0xff] }
  0x11   : > { %379 = vmatpush.bf16.msra.mxu0 %v631_v2  ;;  %429 = vmatpush.bf16.msra.mxu1 %v635_v3  ;;  %v665_v45 = vld [vmem:[%s818_s5] ss:$0 sm:$0xff] }
  0x12   : > { %v666_v47 = vld [vmem:[%s819_s6] ss:$0 sm:$0xff] }
  0x14   : > { %611 = vmatmul.msk.bf16.vlgmr.msra.gmra.mxu0 %vm344_vm0, %v347_v6  ;;  %v668_v25 = vpop.eup %667 }
  0x15   : > { %430 = vmatpush.bf16.msra.mxu1 %v634_v7  ;;  %v453_v26 = vmul.f32 32.0, %v668_v25  ;;  %vm457_vm2 = vweird.f32 %v668_v25 }
  0x16   : > { %v386_v15 = vld [vmem:[%s773_s19] sm:$0xff] }
  0x17   : > { %v454_v27 = vsub.f32 1.0, %v453_v26 }
  0x19   : > { %431 = vmatpush.bf16.msra.mxu1 %v633_v8  ;;  %v455_v28 = vmul.f32 %v668_v25, %v454_v27 }
  0x1b   : > { %v456_v29 = vadd.f32 %v668_v25, %v455_v28 }
  0x1d   : > { %v458_v30 = vsel %vm457_vm2, %v668_v25, %v456_v29 }
  0x91   : > { %v381_v10 = vpop.f32.mrf.mxu0 }
  0x92   : > { %v382_v11 = vadd.f32 %v663_v9, %v381_v10 }
  0x94   : > { %v385_v12 = vmax.f32 %v382_v11, 0.0 }
  0x96   : > { %v387_v13 = vpack.c.bf16 %v385_v12, %v385_v12 }
  0x98   : > { %628 = vmatmul.msk.bf16.vlgmr.msra.gmra.mxu1 %vm420_vm1, %v387_v13 }
  0x99   : > { %v383_v14 = vpop.f32.mrf.mxu0 }
 0x115   : > { %v433_v16 = vpop.f32.mrf.mxu1 }
 0x116   : > { %v437_v17 = vadd.f32 %v433_v16, %v386_v15 }
 0x118   : > { %438 = vst.msk [vmem:[%s773_s19] sm:$0xff] %vm344_vm0, %v437_v17 }
 0x11d   : > { %v435_v18 = vpop.f32.mrf.mxu1 }
 0x11f   : > { %v442_v20 = vld [vmem:[%s773_s19] sm:$0xff] }
 0x120   : > { %v443_v21 = vadd.f32 %v442_v20, %v346_v5 }
 0x122   : > { %v448_v22 = vadd.f32 %v664_v19, %v443_v21 }
 0x124   : > { %v449_v23 = vsel %vm344_vm0, %v448_v22, 0.0 }
 0x125   : > { %450 = vadd.xlane.f32.xlu0 %v449_v23 }
 0x198   : > { %v451_v31 = vpop.xlane.xlu0 %450 }
 0x199   : > { %v459_v32 = vmul.f32 %v458_v30, %v451_v31 }
 0x19b   : > { %v460_v33 = vsub.f32 %v448_v22, %v459_v32 }
 0x19d   : > { %v461_v34 = vmul.f32 %v460_v33, %v460_v33 }
 0x19f   : > { %v462_v35 = vsel %vm344_vm0, %v461_v34, 0.0 }
 0x1a0   : > { %463 = vadd.xlane.f32.xlu0 %v462_v35 }
 0x213   : > { %v464_v36 = vpop.xlane.xlu0 %463 }
 0x214   : > { %v465_v37 = vmul.f32 %v464_v36, %v458_v30 }
 0x216   : > { %v466_v38 = vadd.f32 1e-05, %v465_v37 }
 0x218   : > { %669 = vrsqrt.f32 %v466_v38  ;;  %vm473_vm4 = vweird.f32 %v466_v38 }
 0x21e   : > { %v670_v39 = vpop.eup %669 }
 0x21f   : > { %v468_v40 = vmul.f32 %v670_v39, %v466_v38  ;;  %vm474_vm3 = vweird.f32 %v670_v39 }
 0x220   : > { %vm475_vm5 = vmor %vm473_vm4, %vm474_vm3 }
 0x221   : > { %v469_v41 = vmul.f32 %v670_v39, %v468_v40 }
 0x223   : > { %v470_v42 = vmul.f32 0.5, %v469_v41 }
 0x225   : > { %v471_v43 = vsub.f32 1.5, %v470_v42 }
 0x227   : > { %v472_v44 = vmul.f32 %v670_v39, %v471_v43 }
 0x229   : > { %v476_v46 = vsel %vm475_vm5, %v670_v39, %v472_v44 }
 0x22a   : > { %v477_v48 = vmul.f32 %v476_v46, %v460_v33 }
 0x22c   : > { %v482_v49 = vmul.f32 %v665_v45, %v477_v48 }
 0x22e   : > { %v487_v50 = vadd.f32 %v666_v47, %v482_v49 }
 0x230   : > { %488 = vst.msk [vmem:[%s773_s19] sm:$0xff] %vm344_vm0, %v487_v50 }
 0x231 PF: > { %s17_s26 = sadd.s32 1, %s693_s26   ;;  %s821_s24 = smov %s689_s25 }
 0x232   : > { %p14_p5 = scmp.ge.s32.totalorder %s17_s26, 4   ;;  %s822_s25 = smov %s824_s27 }
 0x234   :  { %16 = sbr.rel (!%p14_p5) target bundleno = 2 (0x2), region = 95 }

// kernel: man_encoder_layer.7
= control target key start
LH: loop header
LB: loop body
LE: loop exit
PB: predicated region body
PF: predicated region fallthrough
CT: control target
= control target key end

     0   :  { %s957_s15 = smov 0   ;;  %s959_s16 = smov 0   ;;  %s1110_s0 = inlined_call_operand.vmem [shape: bf16[8,8,8], index: 0, kind: input, shape index: {}]   ;;  %s1111_s1 = inlined_call_operand.vmem [shape: bf16[8,8,8], index: 1, kind: input, shape index: {}]   ;;  %s1112_s2 = inlined_call_operand.vmem [shape: bf16[8,8,8], index: 2, kind: input, shape index: {}]   ;;  %s1113_s3 = inlined_call_operand.vmem [shape: f32[2,1,8], index: 3, kind: input, shape index: {}]   ;;  %s1114_s4 = inlined_call_operand.vmem [shape: bf16[8,8,8], index: 4, kind: output, shape index: {}]  }
   0x1   :  { %s961_s17 = smov 0  }
   0x2 LB: > { %s33_s18 = sadd.s32 1, %s923_s16  ;;  %p831_p0 = scmp.ge.s32.totalorder %s927_s17, 1  ;;  %s927_s17 = sphi %s961_s17, %s14_s17   ;;  %s923_s16 = sphi %s959_s16, %s1116_s16   ;;  %s919_s15 = sphi %s957_s15, %s1115_s15  }
   0x3   : > { %p35_p1 = scmp.ge.s32.totalorder %s33_s18, 2  ;;  %p234_p2 = scmp.lt.s32.totalorder %s927_s17, 3 }
   0x5   : > { %s1118_s18 = smov (%p35_p1, %s33_s18), 0  ;;  %p235_p3 = pnand %p831_p0, %p234_p2 }
   0x6   : > { %s832_s19 = sshll.u32 (!%p235_p3), %s919_s15, 2  ;;  %p315_p4 = scmp.lt.s32.totalorder (!%p235_p3), %s919_s15, 1 }
   0x7   : > { %238 = sbr.rel (%p235_p3) target bundleno = 700 (0x2bc), region = 36  ;;  %p289_p5 = scmp.lt.s32.totalorder (!%p235_p3), %s832_s19, 7 }
   0xc   : > { %s1120_s15 = smov (!%p315_p4, %s919_s15), 1  ;;  %s1122_s19 = smov (!%p289_p5, %s832_s19), 7  ;;  %vm344_vm0 = vcmask 64512   ;;  %vm335_vm1 = vcmask 7168   ;;  %v929_v12 = vmov -inf   ;;  %v930_v30 = vmov 0  }
   0xd   : > { %s320_s22 = scalar_lea.vmem %s1113_s3, %s1120_s15  ;;  %s981_s23 = sshll.u32 %s1122_s19, 2  ;;  %336 = vst.msk [vmem:[#allocation2] sm:$0xff] %vm335_vm1, %v929_v12  ;;  %878 = vset.pattern.permute.xlu0 %v930_v30  ;;  %877 = vset.pattern.permute.xlu2 %v930_v30  ;;  %v931_v31 = vmov 0.0   ;;  %vm570_vm2 = vcmask 1043456   ;;  %vm699_vm3 = vcmask 60416  }
   0xe   : > { %s304_s26 = scalar_lea.vmem %s1111_s1, %s981_s23  ;;  %s295_s29 = scalar_lea.vmem %s1110_s0, %s981_s23  ;;  %337 = vst.msk [vmem:[#allocation2 + $0x8] sm:$0xff] %vm335_vm1, %v929_v12  ;;  %v880_v13 = vld [vmem:[%s320_s22] ss:$0 sm:$0xff]  ;;  %879 = vset.pattern.permute.xlu1 %v930_v30 }
   0xf   : > { %v353_v0 = vld [vmem:[%s304_s26] sm:$0xf]  ;;  %v355_v1 = vld [vmem:[%s304_s26 + $0x8] sm:$0xf]  ;;  %v354_v4 = vld [vmem:[%s304_s26 + $0x4] sm:$0xf]  ;;  %s313_s8 = scalar_lea.vmem %s1112_s2, %s981_s23  ;;  %s328_s11 = scalar_lea.vmem %s1114_s4, %s981_s23 }
  0x10   : > { %v366_v2 = vsel %vm344_vm0, %v353_v0, 0  ;;  %v404_v3 = vsel %vm344_vm0, %v355_v1, 0  ;;  %v385_v5 = vsel %vm344_vm0, %v354_v4, 0  ;;  %v356_v6 = vld [vmem:[%s304_s26 + $0xc] sm:$0xf]  ;;  %338 = vst.msk [vmem:[#allocation2 + $0x10] sm:$0xff] %vm335_vm1, %v929_v12 }
  0x11   : > { %375 = vmatpush.bf16.xpose.msra.mxu0 %v366_v2  ;;  %413 = vmatpush.bf16.xpose.msra.mxu2 %v404_v3  ;;  %v423_v7 = vsel %vm344_vm0, %v356_v6, 0  ;;  %v349_v8 = vld [vmem:[%s295_s29] sm:$0xf]  ;;  %v351_v9 = vld [vmem:[%s295_s29 + $0x8] sm:$0xf]  ;;  %339 = vst.msk [vmem:[#allocation2 + $0x18] sm:$0xff] %vm335_vm1, %v929_v12 }
  0x12   : > { %394 = vmatpush.bf16.xpose.msra.mxu1 %v385_v5  ;;  %432 = vmatpush.bf16.xpose.msra.mxu3 %v423_v7  ;;  %v350_v10 = vld [vmem:[%s295_s29 + $0x4] sm:$0xf]  ;;  %v352_v11 = vld [vmem:[%s295_s29 + $0xc] sm:$0xf]  ;;  %342 = vst.msk [vmem:[#allocation3 + $0x10] sm:$0xff] %vm335_vm1, %v931_v31 }
  0x13   : > { %340 = vst.msk [vmem:[#allocation3] sm:$0xff] %vm335_vm1, %v931_v31  ;;  %v565_v48 = vld [vmem:[%s313_s8 + $0x8] sm:$0xf]  ;;  %v566_v50 = vld [vmem:[%s313_s8 + $0xc] sm:$0xf] }
  0x14   : > { %341 = vst.msk [vmem:[#allocation3 + $0x8] sm:$0xff] %vm335_vm1, %v931_v31  ;;  %v1032_v32 = vld [vmem:[#allocation2] sm:$0xff]  ;;  %v610_v49 = vsel %vm570_vm2, %v565_v48, 0  ;;  %v629_v51 = vsel %vm570_vm2, %v566_v50, 0 }
  0x15   : > { %343 = vst.msk [vmem:[#allocation3 + $0x18] sm:$0xff] %vm335_vm1, %v931_v31  ;;  %v1044_v38 = vld [vmem:[#allocation2 + $0x8] sm:$0xff]  ;;  %v563_v52 = vld [vmem:[%s313_s8] sm:$0xf]  ;;  %v564_v55 = vld [vmem:[%s313_s8 + $0x4] sm:$0xf] }
  0x16   : > { %345 = vst.msk [vmem:[#allocation4] sm:$0xff] %vm344_vm0, %v931_v31  ;;  %v572_v53 = vsel %vm570_vm2, %v563_v52, 0  ;;  %v591_v57 = vsel %vm570_vm2, %v564_v55, 0 }
  0x17   : > { %346 = vst.msk [vmem:[#allocation4 + $0x8] sm:$0xff] %vm344_vm0, %v931_v31  ;;  %v1042_v36 = vld [vmem:[#allocation2 + $0x10] sm:$0xff] }
  0x18   : > { %840 = vmatmul.msk.bf16.vlgmr.msra.gmra.mxu0 %vm344_vm0, %v349_v8  ;;  %842 = vmatmul.msk.bf16.vlgmr.msra.gmra.mxu2 %vm344_vm0, %v351_v9  ;;  %347 = vst.msk [vmem:[#allocation4 + $0x10] sm:$0xff] %vm344_vm0, %v931_v31  ;;  %v1057_v44 = vld [vmem:[#allocation2 + $0x18] sm:$0xff] }
  0x19   : > { %841 = vmatmul.msk.bf16.vlgmr.msra.gmra.mxu1 %vm344_vm0, %v350_v10  ;;  %843 = vmatmul.msk.bf16.vlgmr.msra.gmra.mxu3 %vm344_vm0, %v352_v11  ;;  %348 = vst.msk [vmem:[#allocation4 + $0x18] sm:$0xff] %vm344_vm0, %v931_v31 }
  0x1a   : > { %619 = vmatpush.bf16.msrb.mxu2 %v610_v49  ;;  %638 = vmatpush.bf16.msrb.mxu3 %v629_v51 }
  0x1b   : > { %581 = vmatpush.bf16.msrb.mxu0 %v572_v53  ;;  %600 = vmatpush.bf16.msrb.mxu1 %v591_v57 }
  0x95   : > { %v377_v14 = vpop.f32.mrf.mxu0 }
  0x96   : > { %v1008_v15 = vadd.f32 %v880_v13, %v377_v14  ;;  %v396_v16 = vpop.f32.mrf.mxu1 }
  0x97   : > { %v1012_v18 = vadd.f32 %v880_v13, %v396_v16 }
  0x98   : > { %v442_v17 = vsel %vm344_vm0, %v1008_v15, -inf }
  0x99   : > { %443 = vmax.xlane.f32.xlu1 %v442_v17  ;;  %v445_v24 = vsel %vm344_vm0, %v1012_v18, -inf }
  0x9b   : > { %v415_v19 = vpop.f32.mrf.mxu2 }
  0x9c   : > { %v1014_v20 = vadd.f32 %v880_v13, %v415_v19  ;;  %v434_v22 = vpop.f32.mrf.mxu3 }
  0x9d   : > { %v379_v21 = vpop.f32.mrf.mxu0  ;;  %v1020_v26 = vadd.f32 %v880_v13, %v434_v22 }
  0x9e   : > { %v448_v23 = vsel %vm344_vm0, %v1014_v20, -inf  ;;  %v398_v25 = vpop.f32.mrf.mxu1 }
  0x9f   : > { %449 = vmax.xlane.f32.xlu0 %v448_v23  ;;  %v451_v28 = vsel %vm344_vm0, %v1020_v26, -inf  ;;  %v504_v23 = vld [vmem:[#allocation3 + $0x10] sm:$0xff] }
  0xa1   : > { %446 = vmax.xlane.f32.xlu1 %v445_v24 }
  0xa3   : > { %v417_v27 = vpop.f32.mrf.mxu2 }
  0xa4   : > { %v436_v29 = vpop.f32.mrf.mxu3 }
  0xa5   : > { %v502_v29 = vld [vmem:[#allocation3] sm:$0xff] }
  0xa7   : > { %452 = vmax.xlane.f32.xlu0 %v451_v28 }
 0x10c   : > { %v444_v33 = vpop.xlane.xlu1 %443 }
 0x10d   : > { %v1035_v34 = vmax.f32 %v1032_v32, %v444_v33 }
 0x10f   : > { %v458_v35 = vsub.f32 %v1032_v32, %v1035_v34  ;;  %652 = vst.msk [vmem:[#allocation2] sm:$0xff] %vm335_vm1, %v1035_v34  ;;  %472 = vperm.xlu0 %878, %v1035_v34  }
 0x112   : > { %v450_v37 = vpop.xlane.xlu0 %449 }
 0x113   : > { %v1047_v39 = vmax.f32 %v1042_v36, %v450_v37 }
 0x114   : > { %v447_v40 = vpop.xlane.xlu1 %446 }
 0x115   : > { %v460_v41 = vsub.f32 %v1042_v36, %v1047_v39  ;;  %654 = vst.msk [vmem:[#allocation2 + $0x10] sm:$0xff] %vm335_vm1, %v1047_v39  ;;  %v455_v42 = vmax.f32 %v1044_v38, %v447_v40  ;;  %482 = vperm.xlu2 %877, %v1047_v39   ;;  %v531_v36 = vld [vmem:[#allocation4] sm:$0xff] }
 0x117   : > { %v459_v43 = vsub.f32 %v1044_v38, %v455_v42  ;;  %653 = vst.msk [vmem:[#allocation2 + $0x8] sm:$0xff] %vm335_vm1, %v455_v42  ;;  %477 = vperm.xlu1 %879, %v455_v42   ;;  %v466_v16 = vmul.f32 1.442695, %v460_v41 }
 0x119   : > { %v464_v17 = vmul.f32 1.442695, %v459_v43 }
 0x11a   : > { %v453_v45 = vpop.xlane.xlu0 %452 }
 0x11b   : > { %v1060_v46 = vmax.f32 %v1057_v44, %v453_v45 }
 0x11d   : > { %v461_v47 = vsub.f32 %v1057_v44, %v1060_v46  ;;  %655 = vst.msk [vmem:[#allocation2 + $0x18] sm:$0xff] %vm335_vm1, %v1060_v46  ;;  %487 = vperm.xlu2 %877, %v1060_v46  }
 0x11f   : > { %v468_v22 = vmul.f32 1.442695, %v461_v47  ;;  %v533_v47 = vld [vmem:[#allocation4 + $0x10] sm:$0xff] }
 0x16f   : > { %v483_v54 = vpop.permute.xlu2 %482 }
 0x170   : > { %v492_v56 = vsub.f32 %v1014_v20, %v483_v54 }
 0x172   : > { %v498_v58 = vmul.f32 1.442695, %v492_v56 }
 0x174   : > { %881 = vpow2.f32 %v498_v58  ;;  %v532_v58 = vld [vmem:[#allocation4 + $0x8] sm:$0xff] }
 0x177   : > { %v488_v59 = vpop.permute.xlu2 %487 }
 0x178   : > { %v493_v60 = vsub.f32 %v1020_v26, %v488_v59 }
 0x17a   : > { %v882_v61 = vpop.eup %881  ;;  %v500_v62 = vmul.f32 1.442695, %v493_v60 }
 0x17b   : > { %v516_v63 = vsel %vm344_vm0, %v882_v61, 0.0  ;;  %v561_v0 = vpack.c.bf16 %v882_v61, %v882_v61 }
 0x17c   : > { %883 = vpow2.f32 %v500_v62  ;;  %517 = vadd.xlane.f32.xlu0 %v516_v63  ;;  %v505_v62 = vld [vmem:[#allocation3 + $0x18] sm:$0xff] }
 0x17d   : > { %846 = vmatmul.msk.bf16.vlgmr.msrb.gmra.mxu2 %vm344_vm0, %v561_v0 }
 0x181   : > { %v473_v1 = vpop.permute.xlu0 %472 }
 0x182   : > { %v884_v2 = vpop.eup %883  ;;  %v490_v3 = vsub.f32 %v1008_v15, %v473_v1  ;;  %v462_v15 = vmul.f32 1.442695, %v458_v35  ;;  %v503_v35 = vld [vmem:[#allocation3 + $0x8] sm:$0xff] }
 0x183   : > { %v562_v4 = vpack.c.bf16 %v884_v2, %v884_v2  ;;  %v519_v21 = vsel %vm344_vm0, %v884_v2, 0.0  ;;  %v534_v2 = vld [vmem:[#allocation4 + $0x18] sm:$0xff] }
 0x184   : > { %v494_v5 = vmul.f32 1.442695, %v490_v3 }
 0x185   : > { %847 = vmatmul.msk.bf16.vlgmr.msrb.gmra.mxu3 %vm344_vm0, %v562_v4 }
 0x186   : > { %885 = vpow2.f32 %v494_v5 }
 0x189   : > { %v478_v6 = vpop.permute.xlu1 %477 }
 0x18a   : > { %v491_v7 = vsub.f32 %v1012_v18, %v478_v6 }
 0x18c   : > { %v886_v8 = vpop.eup %885  ;;  %v496_v9 = vmul.f32 1.442695, %v491_v7 }
 0x18d   : > { %v510_v10 = vsel %vm344_vm0, %v886_v8, 0.0  ;;  %v559_v11 = vpack.c.bf16 %v886_v8, %v886_v8 }
 0x18e   : > { %887 = vpow2.f32 %v496_v9  ;;  %511 = vadd.xlane.f32.xlu2 %v510_v10 }
 0x18f   : > { %844 = vmatmul.msk.bf16.vlgmr.msrb.gmra.mxu0 %vm344_vm0, %v559_v11  ;;  %889 = vpow2.f32 %v462_v15 }
 0x190   : > { %891 = vpow2.f32 %v466_v16 }
 0x191   : > { %893 = vpow2.f32 %v464_v17 }
 0x192   : > { %895 = vpow2.f32 %v468_v22 }
 0x194   : > { %v888_v12 = vpop.eup %887 }
 0x195   : > { %v513_v13 = vsel %vm344_vm0, %v888_v12, 0.0  ;;  %v560_v14 = vpack.c.bf16 %v888_v12, %v888_v12  ;;  %v890_v18 = vpop.eup %889 }
 0x196   : > { %514 = vadd.xlane.f32.xlu1 %v513_v13  ;;  %v892_v19 = vpop.eup %891  ;;  %v506_v32 = vmul.f32 %v890_v18, %v502_v29 }
 0x197   : > { %845 = vmatmul.msk.bf16.vlgmr.msrb.gmra.mxu1 %vm344_vm0, %v560_v14  ;;  %v894_v20 = vpop.eup %893  ;;  %v508_v25 = vmul.f32 %v892_v19, %v504_v23 }
 0x198   : > { %v896_v24 = vpop.eup %895  ;;  %v507_v39 = vmul.f32 %v894_v20, %v503_v35 }
 0x199   : > { %v509_v63 = vmul.f32 %v896_v24, %v505_v62 }
 0x1a6   : > { %537 = vperm.xlu2 %877, %v890_v18  }
 0x1ae   : > { %547 = vperm.xlu2 %877, %v892_v19  }
 0x1af   : > { %542 = vperm.xlu1 %879, %v894_v20  }
 0x1d7   : > { %520 = vadd.xlane.f32.xlu2 %v519_v21 }
 0x1ef   : > { %v518_v26 = vpop.xlane.xlu0 %517  ;;  %552 = vperm.xlu2 %877, %v896_v24  }
 0x1f0   : > { %v524_v27 = vadd.f32 %v518_v26, %v508_v25 }
 0x1f2   : > { %529 = vst.msk [vmem:[#allocation3 + $0x10] sm:$0xff] %vm335_vm1, %v524_v27 }
 0x1f9   : > { %v661_v28 = vld [vmem:[#allocation3 + $0x10] sm:$0xff] }
 0x1fa   : > { %897 = vrcp.f32 %v661_v28 }
 0x200   : > { %v898_v30 = vpop.eup %897  ;;  %v621_v31 = vpop.f32.mrf.mxu2 }
 0x201   : > { %v512_v33 = vpop.xlane.xlu2 %511  ;;  %683 = vperm.xlu1 %879, %v898_v30  }
 0x202   : > { %v522_v34 = vadd.f32 %v512_v33, %v506_v32 }
 0x204   : > { %527 = vst.msk [vmem:[#allocation3] sm:$0xff] %vm335_vm1, %v522_v34 }
 0x208   : > { %v623_v37 = vpop.f32.mrf.mxu2  ;;  %v640_v38 = vpop.f32.mrf.mxu3 }
 0x209   : > { %v538_v40 = vpop.permute.xlu2 %537  ;;  %v515_v41 = vpop.xlane.xlu1 %514 }
 0x20a   : > { %v555_v42 = vmul.f32 %v538_v40, %v531_v36  ;;  %v523_v43 = vadd.f32 %v515_v41, %v507_v39 }
 0x20b   : > { %v659_v44 = vld [vmem:[#allocation3] sm:$0xff] }
 0x20c   : > { %528 = vst.msk [vmem:[#allocation3 + $0x8] sm:$0xff] %vm335_vm1, %v523_v43  ;;  %v583_v45 = vpop.f32.mrf.mxu0  ;;  %899 = vrcp.f32 %v659_v44 }
 0x20d   : > { %v644_v46 = vadd.f32 %v583_v45, %v555_v42 }
 0x20f   : > { %648 = vst.msk [vmem:[#allocation4] sm:$0xff] %vm344_vm0, %v644_v46 }
 0x210   : > { %v642_v48 = vpop.f32.mrf.mxu3 }
 0x211   : > { %v548_v49 = vpop.permute.xlu2 %547 }
 0x212   : > { %v900_v50 = vpop.eup %899  ;;  %v557_v51 = vmul.f32 %v548_v49, %v533_v47 }
 0x213   : > { %673 = vperm.xlu0 %878, %v900_v50   ;;  %v660_v52 = vld [vmem:[#allocation3 + $0x8] sm:$0xff] }
 0x214   : > { %v646_v53 = vadd.f32 %v621_v31, %v557_v51  ;;  %v585_v54 = vpop.f32.mrf.mxu0  ;;  %v602_v55 = vpop.f32.mrf.mxu1  ;;  %901 = vrcp.f32 %v660_v52 }
 0x216   : > { %650 = vst.msk [vmem:[#allocation4 + $0x10] sm:$0xff] %vm344_vm0, %v646_v53  ;;  %v667_v13 = vld [vmem:[#allocation4] sm:$0xff] }
 0x21a   : > { %v902_v56 = vpop.eup %901 }
 0x21b   : > { %678 = vperm.xlu2 %877, %v902_v56  }
 0x21c   : > { %v604_v57 = vpop.f32.mrf.mxu1 }
 0x21d   : > { %v669_v11 = vld [vmem:[#allocation4 + $0x10] sm:$0xff] }
 0x221   : > { %v543_v59 = vpop.permute.xlu1 %542 }
 0x222   : > { %v556_v60 = vmul.f32 %v543_v59, %v532_v58 }
 0x224   : > { %v645_v61 = vadd.f32 %v602_v55, %v556_v60 }
 0x226   : > { %649 = vst.msk [vmem:[#allocation4 + $0x8] sm:$0xff] %vm344_vm0, %v645_v61 }
 0x22d   : > { %v668_v10 = vld [vmem:[#allocation4 + $0x8] sm:$0xff] }
 0x24a   : > { %v521_v0 = vpop.xlane.xlu2 %520 }
 0x24b   : > { %v525_v1 = vadd.f32 %v521_v0, %v509_v63 }
 0x24d   : > { %530 = vst.msk [vmem:[#allocation3 + $0x18] sm:$0xff] %vm335_vm1, %v525_v1 }
 0x252   : > { %v553_v3 = vpop.permute.xlu2 %552 }
 0x253   : > { %v558_v4 = vmul.f32 %v553_v3, %v534_v2 }
 0x254   : > { %v662_v5 = vld [vmem:[#allocation3 + $0x18] sm:$0xff] }
 0x255   : > { %v647_v6 = vadd.f32 %v640_v38, %v558_v4  ;;  %903 = vrcp.f32 %v662_v5 }
 0x257   : > { %651 = vst.msk [vmem:[#allocation4 + $0x18] sm:$0xff] %vm344_vm0, %v647_v6 }
 0x25b   : > { %v904_v7 = vpop.eup %903 }
 0x25c   : > { %688 = vperm.xlu2 %877, %v904_v7  }
 0x25e   : > { %v670_v20 = vld [vmem:[#allocation4 + $0x18] sm:$0xff] }
 0x273   : > { %v684_v9 = vpop.permute.xlu1 %683 }
 0x274   : > { %v693_v15 = vmul.f32 %v684_v9, %v669_v11 }
 0x275   : > { %v679_v8 = vpop.permute.xlu2 %678 }
 0x276   : > { %v692_v12 = vmul.f32 %v679_v8, %v668_v10  ;;  %v697_v19 = vpack.c.bf16 %v693_v15, %v693_v15 }
 0x278   : > { %v696_v18 = vpack.c.bf16 %v692_v12, %v692_v12  ;;  %702 = vst.msk [vmem:[%s328_s11 + $0x8] sm:$0xf] %vm699_vm3, %v697_v19 }
 0x27a   : > { %701 = vst.msk [vmem:[%s328_s11 + $0x4] sm:$0xf] %vm699_vm3, %v696_v18 }
 0x285   : > { %v674_v14 = vpop.permute.xlu0 %673 }
 0x286   : > { %v691_v16 = vmul.f32 %v674_v14, %v667_v13 }
 0x288   : > { %v695_v17 = vpack.c.bf16 %v691_v16, %v691_v16 }
 0x28a   : > { %700 = vst.msk [vmem:[%s328_s11] sm:$0xf] %vm699_vm3, %v695_v17 }
 0x2b6   : > { %v689_v21 = vpop.permute.xlu2 %688 }
 0x2b7   : > { %v694_v22 = vmul.f32 %v689_v21, %v670_v20 }
 0x2b9   : > { %v698_v23 = vpack.c.bf16 %v694_v22, %v694_v22 }
 0x2bb   : > { %703 = vst.msk [vmem:[%s328_s11 + $0xc] sm:$0xf] %vm699_vm3, %v698_v23 }
 0x2bc PF: > { %s14_s17 = sadd.s32 1, %s927_s17   ;;  %s1115_s15 = smov %s923_s16 }
 0x2bd   : > { %p11_p6 = scmp.ge.s32.totalorder %s14_s17, 4   ;;  %s1116_s16 = smov %s1118_s18 }
 0x2bf   :  { %13 = sbr.rel (!%p11_p6) target bundleno = 2 (0x2), region = 83 }

// kernel: man_encoder_layer.8
= control target key start
LH: loop header
LB: loop body
LE: loop exit
PB: predicated region body
PF: predicated region fallthrough
CT: control target
= control target key end

     0   :  { %s492_s21 = smov 0   ;;  %s539_s0 = inlined_call_operand.vmem [shape: f32[16,32], index: 0, kind: input, shape index: {}]   ;;  %s540_s1 = inlined_call_operand.vmem [shape: bf16[16,32], index: 1, kind: input, shape index: {}]   ;;  %s541_s2 = inlined_call_operand.vmem [shape: bf16[32,32], index: 2, kind: input, shape index: {}]   ;;  %s542_s3 = inlined_call_operand.vmem [shape: f32[1,32], index: 3, kind: input, shape index: {}]   ;;  %s543_s4 = inlined_call_operand.vmem [shape: f32[1,32], index: 4, kind: input, shape index: {}]   ;;  %s544_s5 = inlined_call_operand.vmem [shape: f32[1,32], index: 5, kind: input, shape index: {}]   ;;  %s545_s6 = inlined_call_operand.vmem [shape: f32[16,32], index: 6, kind: output, shape index: {}]  }
   0x1 LB: > { %s411_s22 = sadd.s32 4294967295, %s454_s21   ;;  %p415_p0 = scmp.ge.s32.totalorder %s454_s21, 1  ;;  %s454_s21 = sphi %s492_s21, %s16_s21  }
   0x2   : > { %p220_p1 = scmp.lt.s32.totalorder %s454_s21, 3 }
   0x4   : > { %p221_p2 = pnand %p415_p0, %p220_p1 }
   0x5   : > { %p252_p3 = scmp.lt.s32.totalorder (!%p221_p2), %s411_s22, 1 }
   0x6   : > { %224 = sbr.rel (%p221_p2) target bundleno = 418 (0x1a2), region = 44 }
   0xb   : > { %v431_v0 = vld [vmem:[%s541_s2 + $0x8] sm:$0xff]  ;;  %v430_v1 = vld [vmem:[%s541_s2] sm:$0xff]  ;;  %s547_s22 = smov (!%p252_p3, %s411_s22), 1  ;;  %vm283_vm0 = vcmask 261120   ;;  %v456_v10 = vmov 32.0  }
   0xc   : > { %293 = vmatpush.bf16.msra.mxu0 %v431_v0  ;;  %s417_s27 = sshll.u32 %s547_s22, 2  ;;  %s416_s7 = sshll.u32 %s547_s22, 3  ;;  %v441_v4 = vld [vmem:[%s542_s3] ss:$0 sm:$0xff]  ;;  %444 = vrcp.f32 %v456_v10 }
   0xd   : > { %s259_s30 = scalar_lea.vmem %s540_s1, %s417_s27  ;;  %s255_s10 = scalar_lea.vmem %s539_s0, %s416_s7  ;;  %v442_v31 = vld [vmem:[%s543_s4] ss:$0 sm:$0xff] }
   0xe   : > { %v266_v2 = vld [vmem:[%s259_s30] sm:$0xf]  ;;  %s263_s19 = scalar_lea.vmem %s545_s6, %s416_s7 }
   0xf   : > { %v265_v3 = vld [vmem:[%s255_s10] sm:$0xff] }
  0x10   : > { %294 = vmatpush.bf16.msra.mxu0 %v430_v1  ;;  %v443_v33 = vld [vmem:[%s544_s5] ss:$0 sm:$0xff] }
  0x12   : > { %v445_v11 = vpop.eup %444 }
  0x13   : > { %427 = vmatmul.msk.bf16.vlgmr.msra.gmra.mxu0 %vm283_vm0, %v266_v2  ;;  %v310_v12 = vmul.f32 32.0, %v445_v11  ;;  %vm314_vm1 = vweird.f32 %v445_v11 }
  0x15   : > { %v311_v13 = vsub.f32 1.0, %v310_v12 }
  0x17   : > { %v312_v14 = vmul.f32 %v445_v11, %v311_v13 }
  0x19   : > { %v313_v15 = vadd.f32 %v445_v11, %v312_v14 }
  0x1b   : > { %v315_v16 = vsel %vm314_vm1, %v445_v11, %v313_v15 }
  0x90   : > { %v296_v5 = vpop.f32.mrf.mxu0 }
  0x91   : > { %v300_v6 = vadd.f32 %v296_v5, %v265_v3 }
  0x93   : > { %v305_v7 = vadd.f32 %v441_v4, %v300_v6 }
  0x95   : > { %v306_v8 = vsel %vm283_vm0, %v305_v7, 0.0 }
  0x96   : > { %307 = vadd.xlane.f32.xlu0 %v306_v8 }
  0x98   : > { %v298_v9 = vpop.f32.mrf.mxu0 }
 0x109   : > { %v308_v17 = vpop.xlane.xlu0 %307 }
 0x10a   : > { %v316_v18 = vmul.f32 %v315_v16, %v308_v17 }
 0x10c   : > { %v317_v19 = vsub.f32 %v305_v7, %v316_v18 }
 0x10e   : > { %v318_v20 = vmul.f32 %v317_v19, %v317_v19 }
 0x110   : > { %v319_v21 = vsel %vm283_vm0, %v318_v20, 0.0 }
 0x111   : > { %320 = vadd.xlane.f32.xlu0 %v319_v21 }
 0x184   : > { %v321_v22 = vpop.xlane.xlu0 %320 }
 0x185   : > { %v322_v23 = vmul.f32 %v321_v22, %v315_v16 }
 0x187   : > { %v323_v24 = vadd.f32 1e-05, %v322_v23 }
 0x189   : > { %446 = vrsqrt.f32 %v323_v24  ;;  %vm330_vm3 = vweird.f32 %v323_v24 }
 0x18f   : > { %v447_v25 = vpop.eup %446 }
 0x190   : > { %v325_v26 = vmul.f32 %v447_v25, %v323_v24  ;;  %vm331_vm2 = vweird.f32 %v447_v25 }
 0x191   : > { %vm332_vm4 = vmor %vm330_vm3, %vm331_vm2 }
 0x192   : > { %v326_v27 = vmul.f32 %v447_v25, %v325_v26 }
 0x194   : > { %v327_v28 = vmul.f32 0.5, %v326_v27 }
 0x196   : > { %v328_v29 = vsub.f32 1.5, %v327_v28 }
 0x198   : > { %v329_v30 = vmul.f32 %v447_v25, %v328_v29 }
 0x19a   : > { %v333_v32 = vsel %vm332_vm4, %v447_v25, %v329_v30 }
 0x19b   : > { %v334_v34 = vmul.f32 %v333_v32, %v317_v19 }
 0x19d   : > { %v339_v35 = vmul.f32 %v442_v31, %v334_v34 }
 0x19f   : > { %v344_v36 = vadd.f32 %v443_v33, %v339_v35 }
 0x1a1   : > { %345 = vst.msk [vmem:[%s263_s19] sm:$0xff] %vm283_vm0, %v344_v36 }
 0x1a2 PF: > { %s16_s21 = sadd.s32 1, %s454_s21  }
 0x1a3   : > { %p13_p4 = scmp.ge.s32.totalorder %s16_s21, 4  }
 0x1a5   :  { %15 = sbr.rel (!%p13_p4) target bundleno = 1 (0x1), region = 77 }

// kernel: man_encoder_layer.9
= control target key start
LH: loop header
LB: loop body
LE: loop exit
PB: predicated region body
PF: predicated region fallthrough
CT: control target
= control target key end

     0   :  { %12 = vsyncpa [#allocation3], 0  ;;  %s992_s0 = inlined_call_operand.vmem [shape: f32[16,32], index: 0, kind: input, shape index: {}]   ;;  %s993_s1 = inlined_call_operand.vmem [shape: bf16[32,64], index: 1, kind: input, shape index: {}]   ;;  %s994_s2 = inlined_call_operand.vmem [shape: f32[1,64], index: 2, kind: input, shape index: {}]   ;;  %s995_s3 = inlined_call_operand.vmem [shape: bf16[64,32], index: 3, kind: input, shape index: {}]   ;;  %s996_s4 = inlined_call_operand.vmem [shape: f32[1,32], index: 4, kind: input, shape index: {}]   ;;  %s997_s5 = inlined_call_operand.vmem [shape: f32[1,32], index: 5, kind: input, shape index: {}]   ;;  %s998_s6 = inlined_call_operand.vmem [shape: f32[1,32], index: 6, kind: input, shape index: {}]   ;;  %s999_s7 = inlined_call_operand.hbm [shape: f32[16,32], index: 7, kind: output, shape index: {}]  }
   0x1   :  { %14 = vsyncpa [#allocation3 + $0x1], 0  ;;  %s847_s24 = smov 0   ;;  %s849_s25 = smov 0  }
   0x2   :  { %s851_s26 = smov 0   ;;  %s853_s27 = smov 0  }
   0x3   :  { %s855_s28 = smov 0   ;;  %s857_s29 = smov 0  }
   0x4 LB: > { %s614_s30 = sadd.s32 4294967295, %s803_s29   ;;  %s615_s8 = sadd.s32 4294967294, %s803_s29   ;;  %s803_s29 = sphi %s857_s29, %s20_s29   ;;  %s799_s28 = sphi %s855_s28, %s1006_s28   ;;  %s795_s27 = sphi %s853_s27, %s1005_s27   ;;  %s791_s26 = sphi %s851_s26, %s1004_s26   ;;  %s787_s25 = sphi %s849_s25, %s1003_s25   ;;  %s783_s24 = sphi %s847_s24, %s1002_s24  }
   0x5   : > { %s32_s9 = sadd.s32 1, %s799_s28  ;;  %s206_s10 = sadd.s32 1, %s791_s26 }
   0x6   : > { %p34_p0 = scmp.ge.s32.totalorder %s32_s9, 2  ;;  %p216_p1 = scmp.ne.s32.totalorder %s791_s26, %s787_s25 }
   0x7   : > { %p217_p2 = scmp.eq.s32.totalorder %s614_s30, 1  ;;  %p222_p3 = scmp.ne.s32.totalorder %s787_s25, %s783_s24 }
   0x8   : > { %s1008_s9 = smov (%p34_p0, %s32_s9), 0  ;;  %p223_p5 = scmp.eq.s32.totalorder %s615_s8, 1 }
   0x9   : > { %p887_p4 = por %p217_p2, %p216_p1  ;;  %s203_s12 = ssub.s32 %s799_s28, %s1008_s9 }
   0xa   : > { %p621_p6 = scmp.ge.s32.totalorder %s803_s29, 1  ;;  %p204_p7 = scmp.eq.s32.totalorder %s203_s12, 0 }
   0xb   : > { %p894_p8 = por %p223_p5, %p222_p3  ;;  %p279_p9 = scmp.lt.s32.totalorder %s803_s29, 3 }
   0xc   : > { %s900_s14 = scalar_select %p204_p7, %s791_s26, %s206_s10  }
   0xd   : > { %p280_p10 = pnand %p621_p6, %p279_p9 }
   0xe   : > { %p322_p11 = scmp.lt.s32.totalorder (!%p280_p10), %s795_s27, 1  ;;  %s319_s17 = sand.u32 (!%p280_p10), 1, %s787_s25  }
   0xf   : > { %283 = sbr.rel (%p280_p10) target bundleno = 571 (0x23b), region = 48  ;;  %s622_s20 = sshll.u32 (!%p280_p10), %s319_s17, 3 }
  0x10   : > { %s651_s10 = sshll.u32 (!%p280_p10), %s795_s27, 3  ;;  %s745_s16 = scalar_lea.hbm (!%p280_p10), %s999_s7, 16 }
  0x11   : > { %s500_s19 = scalar_lea.hbm (!%p280_p10), %s999_s7, %s651_s10 }
  0x12   : > { %s504_s23 = sshll.u32 (!%p280_p10), %s500_s19, 4  ;;  %s505_s23 = int_to_ptr.hbm [resolvable:$true] %s504_s23 }
  0x13   : > { %s739_s8 = sshra.s32 (!%p280_p10), %s505_s23, 4  ;;  %s740_s8 = int_to_ptr.hbm [resolvable:$true] %s739_s8 }
  0x14   : > { %v655_v0 = vld [vmem:[%s993_s1 + $0x8] sm:$0xff]  ;;  %v659_v1 = vld [vmem:[%s995_s3 + $0x18] sm:$0xff]  ;;  %v654_v2 = vld [vmem:[%s993_s1] sm:$0xff]  ;;  %s323_s21 = scalar_select %p322_p11, %s795_s27, 1  ;;  %vm344_vm0 = vcmask 261120   ;;  %v805_v8 = vmov 0.0  }
  0x15   : > { %378 = vmatpush.bf16.msra.mxu0 %v655_v0  ;;  %428 = vmatpush.bf16.msra.mxu1 %v659_v1  ;;  %v658_v3 = vld [vmem:[%s995_s3 + $0x10] sm:$0xff]  ;;  %v657_v6 = vld [vmem:[%s995_s3 + $0x8] sm:$0xff]  ;;  %v656_v7 = vld [vmem:[%s995_s3] sm:$0xff]  ;;  %vm420_vm1 = vcmask 523264   ;;  %v806_v24 = vmov 32.0   ;;  %s741_s10 = scalar_lea.hbm %s740_s8, 8  ;;  %p746_p1 = scmp.lt.s32.totalorder %s740_s8, %s999_s7 }
  0x16   : > { %s623_s30 = sshll.u32 %s323_s21, 3  ;;  %s929_s21 = scalar_lea.vmem [#allocation2], %s622_s20  ;;  %v717_v9 = vld [vmem:[%s994_s2] ss:$0 sm:$0xff]  ;;  %721 = vrcp.f32 %v806_v24 }
  0x17   : > { %s325_s12 = scalar_lea.vmem %s992_s0, %s623_s30  ;;  %345 = vst.msk [vmem:[%s929_s21] sm:$0xff] %vm344_vm0, %v805_v8  ;;  %v718_v19 = vld [vmem:[%s996_s4] ss:$0 sm:$0xff]  ;;  %s502_s27 = sshll.u32 %s929_s21, 4  ;;  %s503_s27 = int_to_ptr.vmem [resolvable:$true] %s502_s27 }
  0x18   : > { %v346_v4 = vld [vmem:[%s325_s12] sm:$0xff]  ;;  %s490_s30 = scalar_lea.sflag [#allocation3], %s319_s17  ;;  %p742_p12 = scmp.ne.s32.totalorder %s740_s8, %s741_s10 }
  0x19   : > { %379 = vmatpush.bf16.msra.mxu0 %v654_v2  ;;  %429 = vmatpush.bf16.msra.mxu1 %v658_v3  ;;  %v347_v5 = vpack.c.bf16 %v346_v4, %v346_v4  ;;  %v719_v45 = vld [vmem:[%s997_s5] ss:$0 sm:$0xff]  ;;  %p747_p2 = scmp.lt.s32.totalorder %s745_s16, %s741_s10 }
  0x1a   : > { %v720_v47 = vld [vmem:[%s998_s6] ss:$0 sm:$0xff]  ;;  %p743_p13 = pnand %p742_p12, %p887_p4 }
  0x1b   : > { %p748_p3 = por %p747_p2, %p746_p1 }
  0x1c   : > { %632 = vmatmul.msk.bf16.vlgmr.msra.gmra.mxu0 %vm344_vm0, %v347_v5  ;;  %v722_v25 = vpop.eup %721  ;;  %p744_p0 = pneg %p743_p13 }
  0x1d   : > { %430 = vmatpush.bf16.msra.mxu1 %v657_v6  ;;  %v453_v26 = vmul.f32 32.0, %v722_v25  ;;  %vm457_vm2 = vweird.f32 %v722_v25 }
  0x1e   : > { %v386_v15 = vld [vmem:[%s929_s21] sm:$0xff]  ;;  %p749_p5 = pnand %p748_p3, %p744_p0 }
  0x1f   : > { %v454_v27 = vsub.f32 1.0, %v453_v26 }
  0x21   : > { %431 = vmatpush.bf16.msra.mxu1 %v656_v7  ;;  %v455_v28 = vmul.f32 %v722_v25, %v454_v27 }
  0x23   : > { %v456_v29 = vadd.f32 %v722_v25, %v455_v28 }
  0x25   : > { %v458_v30 = vsel %vm457_vm2, %v722_v25, %v456_v29 }
  0x99   : > { %v381_v10 = vpop.f32.mrf.mxu0 }
  0x9a   : > { %v382_v11 = vadd.f32 %v717_v9, %v381_v10 }
  0x9c   : > { %v385_v12 = vmax.f32 %v382_v11, 0.0 }
  0x9e   : > { %v387_v13 = vpack.c.bf16 %v385_v12, %v385_v12 }
  0xa0   : > { %649 = vmatmul.msk.bf16.vlgmr.msra.gmra.mxu1 %vm420_vm1, %v387_v13 }
  0xa1   : > { %v383_v14 = vpop.f32.mrf.mxu0 }
 0x11d   : > { %v433_v16 = vpop.f32.mrf.mxu1 }
 0x11e   : > { %v437_v17 = vadd.f32 %v433_v16, %v386_v15 }
 0x120   : > { %438 = vst.msk [vmem:[%s929_s21] sm:$0xff] %vm344_vm0, %v437_v17 }
 0x125   : > { %v435_v18 = vpop.f32.mrf.mxu1 }
 0x127   : > { %v442_v20 = vld [vmem:[%s929_s21] sm:$0xff] }
 0x128   : > { %v443_v21 = vadd.f32 %v442_v20, %v346_v4 }
 0x12a   : > { %v448_v22 = vadd.f32 %v718_v19, %v443_v21 }
 0x12c   : > { %v449_v23 = vsel %vm344_vm0, %v448_v22, 0.0 }
 0x12d   : > { %450 = vadd.xlane.f32.xlu0 %v449_v23 }
 0x1a0   : > { %v451_v31 = vpop.xlane.xlu0 %450 }
 0x1a1   : > { %v459_v32 = vmul.f32 %v458_v30, %v451_v31 }
 0x1a3   : > { %v460_v33 = vsub.f32 %v448_v22, %v459_v32 }
 0x1a5   : > { %v461_v34 = vmul.f32 %v460_v33, %v460_v33 }
 0x1a7   : > { %v462_v35 = vsel %vm344_vm0, %v461_v34, 0.0 }
 0x1a8   : > { %463 = vadd.xlane.f32.xlu0 %v462_v35 }
 0x21b   : > { %v464_v36 = vpop.xlane.xlu0 %463 }
 0x21c   : > { %v465_v37 = vmul.f32 %v464_v36, %v458_v30 }
 0x21e   : > { %v466_v38 = vadd.f32 1e-05, %v465_v37 }
 0x220   : > { %723 = vrsqrt.f32 %v466_v38  ;;  %vm473_vm4 = vweird.f32 %v466_v38 }
 0x226   : > { %v724_v39 = vpop.eup %723 }
 0x227   : > { %v468_v40 = vmul.f32 %v724_v39, %v466_v38  ;;  %vm474_vm3 = vweird.f32 %v724_v39 }
 0x228   : > { %vm475_vm5 = vmor %vm473_vm4, %vm474_vm3 }
 0x229   : > { %v469_v41 = vmul.f32 %v724_v39, %v468_v40 }
 0x22b   : > { %v470_v42 = vmul.f32 0.5, %v469_v41 }
 0x22d   : > { %v471_v43 = vsub.f32 1.5, %v470_v42 }
 0x22f   : > { %v472_v44 = vmul.f32 %v724_v39, %v471_v43 }
 0x231   : > { %v476_v46 = vsel %vm475_vm5, %v724_v39, %v472_v44 }
 0x232   : > { %v477_v48 = vmul.f32 %v476_v46, %v460_v33 }
 0x234   : > { %v482_v49 = vmul.f32 %v719_v45, %v477_v48 }
 0x236   : > { %v487_v50 = vadd.f32 %v720_v47, %v482_v49 }
 0x238   : > { %488 = vst.msk [vmem:[%s929_s21] sm:$0xff] %vm344_vm0, %v487_v50 }
 0x239   : > { %752 = shalt.err (!%p749_p5)
}
 0x23a   : > { %660 = dma.vmem_to_hbm [thread:$0]  (%p887_p4), %s503_s27, 128, %s505_s23, %s490_s30  }
 0x23b PF: > { %p666_p6 = scmp.ge.s32.totalorder %s803_s29, 2  ;;  %s516_s17 = sand.u32 1, %s783_s24  }
 0x23c   : > { %s517_s21 = scalar_lea.sflag [#allocation3], %s516_s17 }
 0x23d   : > { %p663_p7 = pnand %p666_p6, %p894_p8 }
 0x23f   : > { %p664_p9 = pneg %p663_p7 }
 0x241   : > { %778 = dma.done.wait (%p664_p9), %s517_s21, 128  }
 0x242   : > { %780 = vsyncadd (%p664_p9), %s517_s21, 4294967168  ;;  %s20_s29 = sadd.s32 1, %s803_s29   ;;  %s1002_s24 = smov %s787_s25 }
 0x243   : > { %p17_p10 = scmp.ge.s32.totalorder %s20_s29, 4   ;;  %s1003_s25 = smov %s791_s26 }
 0x244   : > { %s1004_s26 = smov %s900_s14  ;;  %s1005_s27 = smov %s799_s28 }
 0x245   : > { %s1006_s28 = smov %s1008_s9  ;;  %19 = sbr.rel (!%p17_p10) target bundleno = 4 (0x4), region = 100 }
 0x24a   :  { %523 = vsyncpa [#allocation3], 1 }
 0x24b   :  { %525 = vsyncpa [#allocation3 + $0x1], 1 }

</bundles_post_ra>
